<compile_context>
chip_gen: v6e
topology: v6e:2x2x1
jax: 0.10.0
libtpu: 0.0.40
codegen_flags: <defaults>
</compile_context>

<pallas_src>
import math

import jax
import jax.numpy as jnp
from jax.experimental import pallas as pl
from jax.experimental.pallas import tpu as pltpu


def make_transformer_layer_kernel(num_heads: int, after_norm: bool, eps: float = 1e-5):
    def kernel(x_ref, kb_ref,
               wq_ref, bq_ref, wk_ref, bk_ref, wv_ref, bv_ref, wo3_ref, bo_ref,
               g1_ref, be1_ref, g2_ref, be2_ref,
               w1_ref, bf1_ref, w2_ref, bf2_ref,
               o_ref):
        f32 = jnp.float32
        bf16 = jnp.bfloat16

        x = x_ref[0]                  # (S, D) f32
        key_bias = kb_ref[...]        # (1, 1, S) additive mask bias over keys
        S, D = x.shape
        H = num_heads
        dh = D // H
        scale = 1.0 / math.sqrt(dh)

        g1, be1 = g1_ref[...], be1_ref[...]   # (1, D) f32
        g2, be2 = g2_ref[...], be2_ref[...]

        def layer_norm(v, g, b):
            # Keep all VPU/EUP math in f32 (v5e has no bf16 VPU/EUP).
            mu = jnp.mean(v, axis=-1, keepdims=True)
            var = jnp.mean((v - mu) ** 2, axis=-1, keepdims=True)
            return (v - mu) * jax.lax.rsqrt(var + eps) * g + b

        # ---------------- attention block ----------------
        residual = x
        if not after_norm:
            x = layer_norm(x, g1, be1)

        xb = x.astype(bf16)
        # QKV projections: bf16 MXU operands, f32 accumulation, f32 bias add.
        q = jnp.dot(xb, wq_ref[...], preferred_element_type=f32) + bq_ref[...]
        k = jnp.dot(xb, wk_ref[...], preferred_element_type=f32) + bk_ref[...]
        v = jnp.dot(xb, wv_ref[...], preferred_element_type=f32) + bv_ref[...]
        # Fold 1/sqrt(dh) into q once.
        q = q * scale

        # Head-major (H, S, dh) views built by static lane slices + leading-axis
        # stack (no per-head XLU transpose of k, no trailing-axis concat).
        def to_heads(t):
            return jnp.stack([t[:, h * dh:(h + 1) * dh] for h in range(H)], axis=0)

        qh = to_heads(q).astype(bf16)      # (H, S, dh)
        kh = to_heads(k).astype(bf16)
        vh = to_heads(v).astype(bf16)

        # Batched-head attention (flash-style dot pattern, batch dim leading).
        s = jnp.einsum('hqd,hkd->hqk', qh, kh,
                       preferred_element_type=f32)           # (H, S, S) f32
        s = s + key_bias                                      # (1,1,S) key mask
        m = jnp.max(s, axis=-1, keepdims=True)
        p = jnp.exp(s - m)
        denom = jnp.sum(p, axis=-1, keepdims=True)
        p = p * pl.reciprocal(denom, approx=True)             # EUP, frees VALU

        ctx = jnp.einsum('hqk,hkd->hqd', p.astype(bf16), vh,
                         preferred_element_type=f32)          # (H, S, dh)

        # Per-head output projection (wo reshaped (H, dh, D) at trace time),
        # summed over heads -> no head re-concat on the lane axis.
        oh = jnp.einsum('hqd,hdo->hqo', ctx.astype(bf16), wo3_ref[...],
                        preferred_element_type=f32)           # (H, S, D)
        attn = oh[0]
        for h in range(1, H):
            attn = attn + oh[h]
        attn = attn + bo_ref[...]                             # (S, D)

        # dropout -> identity (eval mode)
        x = attn + residual
        if after_norm:
            x = layer_norm(x, g1, be1)

        # ---------------- feed-forward block ----------------
        residual = x
        if not after_norm:
            x = layer_norm(x, g2, be2)
        h1 = jnp.dot(x.astype(bf16), w1_ref[...],
                     preferred_element_type=f32) + bf1_ref[...]
        h1 = jnp.maximum(h1, 0.0)                   # ReLU in f32; dropout -> identity
        ff = jnp.dot(h1.astype(bf16), w2_ref[...],
                     preferred_element_type=f32) + bf2_ref[...]
        x = residual + ff
        if after_norm:
            x = layer_norm(x, g2, be2)

        o_ref[0] = x

    return kernel


def transformer_layer(x, mask, params, *, num_heads, after_norm=True):
    """x: (B, S, D) f32, mask: (B, S) bool (True = valid)."""
    B, S, D = x.shape
    H = num_heads
    dh = D // H

    # Additive key-mask bias, shape (B, 1, S). Note: a fully-masked row yields a
    # uniform softmax over padding (PyTorch's masked_fill(-inf) would give NaN).
    key_bias = jnp.where(mask[:, None, :], 0.0, -1e9).astype(jnp.float32)

    # Matmul weights stored bf16 at the pallas_call boundary (halves HBM/VMEM
    # traffic); biases / LayerNorm params stay f32. Output projection is
    # reshaped to per-head blocks (H, dh, D) at trace time (free).
    bf = lambda w: w.astype(jnp.bfloat16)
    wq, wk, wv = bf(params["wq"]), bf(params["wk"]), bf(params["wv"])
    wo3 = bf(params["wo"]).reshape(H, dh, D)
    w1, w2 = bf(params["w1"]), bf(params["w2"])

    param_list = [
        wq, params["bq"], wk, params["bk"], wv, params["bv"], wo3, params["bo"],
        params["g1"], params["be1"], params["g2"], params["be2"],
        w1, params["bf1"], w2, params["bf2"],
    ]

    kernel = make_transformer_layer_kernel(num_heads, after_norm)
    out_shape = jax.ShapeDtypeStruct((B, S, D), jnp.float32)

    def build(single_buffer_weights: bool):
        def const_spec(shape):
            nd = len(shape)
            idx = lambda b: (0,) * nd
            if single_buffer_weights:
                # Constant index_map -> block never changes across the grid;
                # one buffer is enough (halves weight VMEM vs default double
                # buffering).
                return pl.BlockSpec(shape, idx, pipeline_mode=pl.Buffered(1))
            return pl.BlockSpec(shape, idx)

        in_specs = [
            pl.BlockSpec((1, S, D), lambda b: (b, 0, 0)),   # x: one sequence / step
            pl.BlockSpec((1, 1, S), lambda b: (b, 0, 0)),   # key-mask bias
        ] + [const_spec(p.shape) for p in param_list]

        return pl.pallas_call(
            kernel,
            out_shape=out_shape,
            grid=(B,),
            in_specs=in_specs,
            out_specs=pl.BlockSpec((1, S, D), lambda b: (b, 0, 0)),
            compiler_params=pltpu.CompilerParams(
                # Batch steps are independent -> shard across TensorCores (v7x).
                dimension_semantics=("parallel",),
                # Explicit scoped-VMEM budget (defaults are 16/32 MiB).
                vmem_limit_bytes=64 * 1024 * 1024,
            ),
        )

    try:
        return build(True)(x, key_bias, *param_list)
    except Exception:
        # Fallback for JAX versions without BlockSpec pipeline_mode support.
        return build(False)(x, key_bias, *param_list)


def init_params(key, d_model, feedforward_dim):
    ks = jax.random.split(key, 8)
    s = 0.02

    def lin(k, shape):
        return (s * jax.random.normal(k, shape)).astype(jnp.float32)

    # biases / LN params kept 2D (1, n) so BlockSpecs equal full array dims.
    return {
        "wq": lin(ks[0], (d_model, d_model)), "bq": jnp.zeros((1, d_model), jnp.float32),
        "wk": lin(ks[1], (d_model, d_model)), "bk": jnp.zeros((1, d_model), jnp.float32),
        "wv": lin(ks[2], (d_model, d_model)), "bv": jnp.zeros((1, d_model), jnp.float32),
        "wo": lin(ks[3], (d_model, d_model)), "bo": jnp.zeros((1, d_model), jnp.float32),
        "g1": jnp.ones((1, d_model), jnp.float32), "be1": jnp.zeros((1, d_model), jnp.float32),
        "g2": jnp.ones((1, d_model), jnp.float32), "be2": jnp.zeros((1, d_model), jnp.float32),
        "w1": lin(ks[4], (d_model, feedforward_dim)),
        "bf1": jnp.zeros((1, feedforward_dim), jnp.float32),
        "w2": lin(ks[5], (feedforward_dim, d_model)),
        "bf2": jnp.zeros((1, d_model), jnp.float32),
    }


def ref_forward(x, mask, params, *, num_heads, after_norm=True, eps=1e-5):
    """Pure-JAX f32 reference (matches the PyTorch forward in eval mode)."""
    B, S, D = x.shape
    H = num_heads
    dh = D // H

    def ln(v, g, b):
        mu = jnp.mean(v, axis=-1, keepdims=True)
        var = jnp.mean((v - mu) ** 2, axis=-1, keepdims=True)
        return (v - mu) * jax.lax.rsqrt(var + eps) * g + b

    kb = jnp.where(mask[:, None, None, :], 0.0, -1e9)

    residual = x
    h = x if after_norm else ln(x, params["g1"], params["be1"])
    q = h @ params["wq"] + params["bq"]
    k = h @ params["wk"] + params["bk"]
    v = h @ params["wv"] + params["bv"]
    q = q.reshape(B, S, H, dh).transpose(0, 2, 1, 3)
    k = k.reshape(B, S, H, dh).transpose(0, 2, 1, 3)
    v = v.reshape(B, S, H, dh).transpose(0, 2, 1, 3)
    s = jnp.einsum("bhqd,bhkd->bhqk", q, k) / math.sqrt(dh) + kb
    p = jax.nn.softmax(s, axis=-1)
    ctx = jnp.einsum("bhqk,bhkd->bhqd", p, v)
    ctx = ctx.transpose(0, 2, 1, 3).reshape(B, S, D)
    attn = ctx @ params["wo"] + params["bo"]
    h = attn + residual
    if after_norm:
        h = ln(h, params["g1"], params["be1"])
    residual = h
    if not after_norm:
        h = ln(h, params["g2"], params["be2"])
    f = jnp.maximum(h @ params["w1"] + params["bf1"], 0.0)
    f = f @ params["w2"] + params["bf2"]
    h = residual + f
    if after_norm:
        h = ln(h, params["g2"], params["be2"])
    return h


if __name__ == "__main__":
    B, S, D, H, FF = 2, 8, 32, 4, 64

    key = jax.random.PRNGKey(0)
    kx, kp = jax.random.split(key)
    x = jax.random.normal(kx, (B, S, D), dtype=jnp.float32)

    # mask: True = valid token; pad out last 3 positions of second sequence
    mask = jnp.ones((B, S), dtype=bool)
    mask = mask.at[1, 5:].set(False)

    params = init_params(kp, D, FF)

    out = transformer_layer(x, mask, params, num_heads=H, after_norm=True)
    out = jax.block_until_ready(out)

    assert out.shape == (B, S, D)
    assert bool(jnp.all(jnp.isfinite(out)))

    # Loose tolerance: kernel runs MXU ops with bf16 operands / f32 accumulation.
    ref = ref_forward(x, mask, params, num_heads=H, after_norm=True)
    assert bool(jnp.allclose(out, ref, atol=5e-2, rtol=5e-2))

    print("KERNEL_OK")
</pallas_src>

<mosaic_0001>
module attributes {stable_mosaic.version = 11 : i64} {
  func.func @kernel(%arg0: i32, %arg1: memref<1x8x32xf32, #tpu.memory_space<vmem>>, %arg2: memref<1x1x8xf32, #tpu.memory_space<vmem>>, %arg3: memref<32x32xbf16, #tpu.memory_space<vmem>>, %arg4: memref<1x32xf32, #tpu.memory_space<vmem>>, %arg5: memref<32x32xbf16, #tpu.memory_space<vmem>>, %arg6: memref<1x32xf32, #tpu.memory_space<vmem>>, %arg7: memref<32x32xbf16, #tpu.memory_space<vmem>>, %arg8: memref<1x32xf32, #tpu.memory_space<vmem>>, %arg9: memref<4x8x32xbf16, #tpu.memory_space<vmem>>, %arg10: memref<1x32xf32, #tpu.memory_space<vmem>>, %arg11: memref<1x32xf32, #tpu.memory_space<vmem>>, %arg12: memref<1x32xf32, #tpu.memory_space<vmem>>, %arg13: memref<1x32xf32, #tpu.memory_space<vmem>>, %arg14: memref<1x32xf32, #tpu.memory_space<vmem>>, %arg15: memref<32x64xbf16, #tpu.memory_space<vmem>>, %arg16: memref<1x64xf32, #tpu.memory_space<vmem>>, %arg17: memref<64x32xbf16, #tpu.memory_space<vmem>>, %arg18: memref<1x32xf32, #tpu.memory_space<vmem>>, %arg19: memref<1x8x32xf32, #tpu.memory_space<vmem>>) attributes {dimension_semantics = [#tpu.dimension_semantics<parallel>], iteration_bounds = array<i64: 2>, scalar_prefetch = 0 : i64, scratch_operands = 0 : i64, tpu.core_type = #tpu.core_type<tc>, window_params = [{transform_indices = @transform_0, window_bounds = array<i64: 1, 8, 32>}, {transform_indices = @transform_1, window_bounds = array<i64: 1, 1, 8>}, {pipeline_mode = #tpu.pipeline_mode<synchronous>, transform_indices = @transform_2, window_bounds = array<i64: 32, 32>}, {pipeline_mode = #tpu.pipeline_mode<synchronous>, transform_indices = @transform_3, window_bounds = array<i64: 1, 32>}, {pipeline_mode = #tpu.pipeline_mode<synchronous>, transform_indices = @transform_4, window_bounds = array<i64: 32, 32>}, {pipeline_mode = #tpu.pipeline_mode<synchronous>, transform_indices = @transform_5, window_bounds = array<i64: 1, 32>}, {pipeline_mode = #tpu.pipeline_mode<synchronous>, transform_indices = @transform_6, window_bounds = array<i64: 32, 32>}, {pipeline_mode = #tpu.pipeline_mode<synchronous>, transform_indices = @transform_7, window_bounds = array<i64: 1, 32>}, {pipeline_mode = #tpu.pipeline_mode<synchronous>, transform_indices = @transform_8, window_bounds = array<i64: 4, 8, 32>}, {pipeline_mode = #tpu.pipeline_mode<synchronous>, transform_indices = @transform_9, window_bounds = array<i64: 1, 32>}, {pipeline_mode = #tpu.pipeline_mode<synchronous>, transform_indices = @transform_10, window_bounds = array<i64: 1, 32>}, {pipeline_mode = #tpu.pipeline_mode<synchronous>, transform_indices = @transform_11, window_bounds = array<i64: 1, 32>}, {pipeline_mode = #tpu.pipeline_mode<synchronous>, transform_indices = @transform_12, window_bounds = array<i64: 1, 32>}, {pipeline_mode = #tpu.pipeline_mode<synchronous>, transform_indices = @transform_13, window_bounds = array<i64: 1, 32>}, {pipeline_mode = #tpu.pipeline_mode<synchronous>, transform_indices = @transform_14, window_bounds = array<i64: 32, 64>}, {pipeline_mode = #tpu.pipeline_mode<synchronous>, transform_indices = @transform_15, window_bounds = array<i64: 1, 64>}, {pipeline_mode = #tpu.pipeline_mode<synchronous>, transform_indices = @transform_16, window_bounds = array<i64: 64, 32>}, {pipeline_mode = #tpu.pipeline_mode<synchronous>, transform_indices = @transform_17, window_bounds = array<i64: 1, 32>}, {transform_indices = @transform_18, window_bounds = array<i64: 1, 8, 32>}]} {
    %c0 = arith.constant 0 : index
    %c0_0 = arith.constant 0 : index
    %c0_1 = arith.constant 0 : index
    %0 = vector.load %arg1[%c0, %c0_0, %c0_1] : memref<1x8x32xf32, #tpu.memory_space<vmem>>, vector<1x8x32xf32>
    %1 = vector.shape_cast %0 : vector<1x8x32xf32> to vector<8x32xf32>
    %c0_2 = arith.constant 0 : index
    %c0_3 = arith.constant 0 : index
    %c0_4 = arith.constant 0 : index
    %2 = vector.load %arg2[%c0_2, %c0_3, %c0_4] : memref<1x1x8xf32, #tpu.memory_space<vmem>>, vector<1x1x8xf32>
    %c0_5 = arith.constant 0 : index
    %c0_6 = arith.constant 0 : index
    %3 = vector.load %arg11[%c0_5, %c0_6] : memref<1x32xf32, #tpu.memory_space<vmem>>, vector<1x32xf32>
    %c0_7 = arith.constant 0 : index
    %c0_8 = arith.constant 0 : index
    %4 = vector.load %arg12[%c0_7, %c0_8] : memref<1x32xf32, #tpu.memory_space<vmem>>, vector<1x32xf32>
    %c0_9 = arith.constant 0 : index
    %c0_10 = arith.constant 0 : index
    %5 = vector.load %arg13[%c0_9, %c0_10] : memref<1x32xf32, #tpu.memory_space<vmem>>, vector<1x32xf32>
    %c0_11 = arith.constant 0 : index
    %c0_12 = arith.constant 0 : index
    %6 = vector.load %arg14[%c0_11, %c0_12] : memref<1x32xf32, #tpu.memory_space<vmem>>, vector<1x32xf32>
    %7 = arith.truncf %1 : vector<8x32xf32> to vector<8x32xbf16>
    %c0_13 = arith.constant 0 : index
    %c0_14 = arith.constant 0 : index
    %8 = vector.load %arg3[%c0_13, %c0_14] : memref<32x32xbf16, #tpu.memory_space<vmem>>, vector<32x32xbf16>
    %cst = arith.constant dense<0.000000e+00> : vector<8x32xf32>
    %9 = tpu.matmul %7, %8, %cst {dimension_numbers = #tpu.dot_dimension_numbers<[1], [0], [0], [1], [0, 0, 1, 1], [], []>} : vector<8x32xbf16>, vector<32x32xbf16>, vector<8x32xf32> -> vector<8x32xf32>
    %c0_15 = arith.constant 0 : index
    %c0_16 = arith.constant 0 : index
    %10 = vector.load %arg4[%c0_15, %c0_16] : memref<1x32xf32, #tpu.memory_space<vmem>>, vector<1x32xf32>
    %11 = vector.broadcast %10 : vector<1x32xf32> to vector<8x32xf32>
    %12 = arith.addf %9, %11 : vector<8x32xf32>
    %c0_17 = arith.constant 0 : index
    %c0_18 = arith.constant 0 : index
    %13 = vector.load %arg5[%c0_17, %c0_18] : memref<32x32xbf16, #tpu.memory_space<vmem>>, vector<32x32xbf16>
    %cst_19 = arith.constant dense<0.000000e+00> : vector<8x32xf32>
    %14 = tpu.matmul %7, %13, %cst_19 {dimension_numbers = #tpu.dot_dimension_numbers<[1], [0], [0], [1], [0, 0, 1, 1], [], []>} : vector<8x32xbf16>, vector<32x32xbf16>, vector<8x32xf32> -> vector<8x32xf32>
    %c0_20 = arith.constant 0 : index
    %c0_21 = arith.constant 0 : index
    %15 = vector.load %arg6[%c0_20, %c0_21] : memref<1x32xf32, #tpu.memory_space<vmem>>, vector<1x32xf32>
    %16 = vector.broadcast %15 : vector<1x32xf32> to vector<8x32xf32>
    %17 = arith.addf %14, %16 : vector<8x32xf32>
    %c0_22 = arith.constant 0 : index
    %c0_23 = arith.constant 0 : index
    %18 = vector.load %arg7[%c0_22, %c0_23] : memref<32x32xbf16, #tpu.memory_space<vmem>>, vector<32x32xbf16>
    %cst_24 = arith.constant dense<0.000000e+00> : vector<8x32xf32>
    %19 = tpu.matmul %7, %18, %cst_24 {dimension_numbers = #tpu.dot_dimension_numbers<[1], [0], [0], [1], [0, 0, 1, 1], [], []>} : vector<8x32xbf16>, vector<32x32xbf16>, vector<8x32xf32> -> vector<8x32xf32>
    %c0_25 = arith.constant 0 : index
    %c0_26 = arith.constant 0 : index
    %20 = vector.load %arg8[%c0_25, %c0_26] : memref<1x32xf32, #tpu.memory_space<vmem>>, vector<1x32xf32>
    %21 = vector.broadcast %20 : vector<1x32xf32> to vector<8x32xf32>
    %22 = arith.addf %19, %21 : vector<8x32xf32>
    %cst_27 = arith.constant 0.353553385 : f32
    %23 = vector.broadcast %cst_27 : f32 to vector<8x32xf32>
    %24 = arith.mulf %12, %23 : vector<8x32xf32>
    %25 = vector.extract_strided_slice %24 {offsets = [0, 0], sizes = [8, 8], strides = [1, 1]} : vector<8x32xf32> to vector<8x8xf32>
    %26 = vector.extract_strided_slice %24 {offsets = [0, 8], sizes = [8, 8], strides = [1, 1]} : vector<8x32xf32> to vector<8x8xf32>
    %27 = vector.extract_strided_slice %24 {offsets = [0, 16], sizes = [8, 8], strides = [1, 1]} : vector<8x32xf32> to vector<8x8xf32>
    %28 = vector.extract_strided_slice %24 {offsets = [0, 24], sizes = [8, 8], strides = [1, 1]} : vector<8x32xf32> to vector<8x8xf32>
    %29 = vector.shape_cast %25 : vector<8x8xf32> to vector<1x8x8xf32>
    %30 = vector.shape_cast %26 : vector<8x8xf32> to vector<1x8x8xf32>
    %31 = vector.shape_cast %27 : vector<8x8xf32> to vector<1x8x8xf32>
    %32 = vector.shape_cast %28 : vector<8x8xf32> to vector<1x8x8xf32>
    %33 = tpu.concatenate %29, %30, %31, %32 in 0 : vector<1x8x8xf32>, vector<1x8x8xf32>, vector<1x8x8xf32>, vector<1x8x8xf32> -> vector<4x8x8xf32>
    %34 = arith.truncf %33 : vector<4x8x8xf32> to vector<4x8x8xbf16>
    %35 = vector.extract_strided_slice %17 {offsets = [0, 0], sizes = [8, 8], strides = [1, 1]} : vector<8x32xf32> to vector<8x8xf32>
    %36 = vector.extract_strided_slice %17 {offsets = [0, 8], sizes = [8, 8], strides = [1, 1]} : vector<8x32xf32> to vector<8x8xf32>
    %37 = vector.extract_strided_slice %17 {offsets = [0, 16], sizes = [8, 8], strides = [1, 1]} : vector<8x32xf32> to vector<8x8xf32>
    %38 = vector.extract_strided_slice %17 {offsets = [0, 24], sizes = [8, 8], strides = [1, 1]} : vector<8x32xf32> to vector<8x8xf32>
    %39 = vector.shape_cast %35 : vector<8x8xf32> to vector<1x8x8xf32>
    %40 = vector.shape_cast %36 : vector<8x8xf32> to vector<1x8x8xf32>
    %41 = vector.shape_cast %37 : vector<8x8xf32> to vector<1x8x8xf32>
    %42 = vector.shape_cast %38 : vector<8x8xf32> to vector<1x8x8xf32>
    %43 = tpu.concatenate %39, %40, %41, %42 in 0 : vector<1x8x8xf32>, vector<1x8x8xf32>, vector<1x8x8xf32>, vector<1x8x8xf32> -> vector<4x8x8xf32>
    %44 = arith.truncf %43 : vector<4x8x8xf32> to vector<4x8x8xbf16>
    %45 = vector.extract_strided_slice %22 {offsets = [0, 0], sizes = [8, 8], strides = [1, 1]} : vector<8x32xf32> to vector<8x8xf32>
    %46 = vector.extract_strided_slice %22 {offsets = [0, 8], sizes = [8, 8], strides = [1, 1]} : vector<8x32xf32> to vector<8x8xf32>
    %47 = vector.extract_strided_slice %22 {offsets = [0, 16], sizes = [8, 8], strides = [1, 1]} : vector<8x32xf32> to vector<8x8xf32>
    %48 = vector.extract_strided_slice %22 {offsets = [0, 24], sizes = [8, 8], strides = [1, 1]} : vector<8x32xf32> to vector<8x8xf32>
    %49 = vector.shape_cast %45 : vector<8x8xf32> to vector<1x8x8xf32>
    %50 = vector.shape_cast %46 : vector<8x8xf32> to vector<1x8x8xf32>
    %51 = vector.shape_cast %47 : vector<8x8xf32> to vector<1x8x8xf32>
    %52 = vector.shape_cast %48 : vector<8x8xf32> to vector<1x8x8xf32>
    %53 = tpu.concatenate %49, %50, %51, %52 in 0 : vector<1x8x8xf32>, vector<1x8x8xf32>, vector<1x8x8xf32>, vector<1x8x8xf32> -> vector<4x8x8xf32>
    %54 = arith.truncf %53 : vector<4x8x8xf32> to vector<4x8x8xbf16>
    "tpu.trace_start"() <{level = 10 : i32, message = "hqd,hkd->hqk"}> : () -> ()
    %cst_28 = arith.constant dense<0.000000e+00> : vector<4x8x8xf32>
    %55 = tpu.matmul %34, %44, %cst_28 {dimension_numbers = #tpu.dot_dimension_numbers<[2], [2], [1], [1], [0, 0, 0, 1, 1, 1], [0], [0]>} : vector<4x8x8xbf16>, vector<4x8x8xbf16>, vector<4x8x8xf32> -> vector<4x8x8xf32>
    "tpu.trace_stop"() : () -> ()
    %56 = vector.broadcast %2 : vector<1x1x8xf32> to vector<4x8x8xf32>
    %57 = arith.addf %55, %56 : vector<4x8x8xf32>
    %cst_29 = arith.constant dense<0xFF800000> : vector<4x8xf32>
    %58 = vector.multi_reduction <maximumf>, %57, %cst_29 [2] : vector<4x8x8xf32> to vector<4x8xf32>
    %59 = vector.shape_cast %58 : vector<4x8xf32> to vector<4x8x1xf32>
    %60 = vector.broadcast %59 : vector<4x8x1xf32> to vector<4x8x8xf32>
    %61 = arith.subf %57, %60 : vector<4x8x8xf32>
    %62 = math.exp %61 : vector<4x8x8xf32>
    %cst_30 = arith.constant dense<0.000000e+00> : vector<4x8xf32>
    %63 = vector.multi_reduction <add>, %62, %cst_30 [2] : vector<4x8x8xf32> to vector<4x8xf32>
    %64 = vector.shape_cast %63 : vector<4x8xf32> to vector<4x8x1xf32>
    %65 = tpu.reciprocal %64 {approx = true} : vector<4x8x1xf32> -> vector<4x8x1xf32>
    %66 = vector.broadcast %65 : vector<4x8x1xf32> to vector<4x8x8xf32>
    %67 = arith.mulf %62, %66 : vector<4x8x8xf32>
    %68 = arith.truncf %67 : vector<4x8x8xf32> to vector<4x8x8xbf16>
    "tpu.trace_start"() <{level = 10 : i32, message = "hqk,hkd->hqd"}> : () -> ()
    %cst_31 = arith.constant dense<0.000000e+00> : vector<4x8x8xf32>
    %69 = tpu.matmul %68, %54, %cst_31 {dimension_numbers = #tpu.dot_dimension_numbers<[2], [1], [1], [2], [0, 0, 0, 1, 1, 2], [0], [0]>} : vector<4x8x8xbf16>, vector<4x8x8xbf16>, vector<4x8x8xf32> -> vector<4x8x8xf32>
    "tpu.trace_stop"() : () -> ()
    %70 = arith.truncf %69 : vector<4x8x8xf32> to vector<4x8x8xbf16>
    %c0_32 = arith.constant 0 : index
    %c0_33 = arith.constant 0 : index
    %c0_34 = arith.constant 0 : index
    %71 = vector.load %arg9[%c0_32, %c0_33, %c0_34] : memref<4x8x32xbf16, #tpu.memory_space<vmem>>, vector<4x8x32xbf16>
    "tpu.trace_start"() <{level = 10 : i32, message = "hqd,hdo->hqo"}> : () -> ()
    %cst_35 = arith.constant dense<0.000000e+00> : vector<4x8x32xf32>
    %72 = tpu.matmul %70, %71, %cst_35 {dimension_numbers = #tpu.dot_dimension_numbers<[2], [1], [1], [2], [0, 0, 0, 1, 1, 2], [0], [0]>} : vector<4x8x8xbf16>, vector<4x8x32xbf16>, vector<4x8x32xf32> -> vector<4x8x32xf32>
    "tpu.trace_stop"() : () -> ()
    %73 = vector.extract_strided_slice %72 {offsets = [0, 0, 0], sizes = [1, 8, 32], strides = [1, 1, 1]} : vector<4x8x32xf32> to vector<1x8x32xf32>
    %74 = vector.shape_cast %73 : vector<1x8x32xf32> to vector<8x32xf32>
    %75 = vector.extract_strided_slice %72 {offsets = [1, 0, 0], sizes = [1, 8, 32], strides = [1, 1, 1]} : vector<4x8x32xf32> to vector<1x8x32xf32>
    %76 = vector.shape_cast %75 : vector<1x8x32xf32> to vector<8x32xf32>
    %77 = arith.addf %74, %76 : vector<8x32xf32>
    %78 = vector.extract_strided_slice %72 {offsets = [2, 0, 0], sizes = [1, 8, 32], strides = [1, 1, 1]} : vector<4x8x32xf32> to vector<1x8x32xf32>
    %79 = vector.shape_cast %78 : vector<1x8x32xf32> to vector<8x32xf32>
    %80 = arith.addf %77, %79 : vector<8x32xf32>
    %81 = vector.extract_strided_slice %72 {offsets = [3, 0, 0], sizes = [1, 8, 32], strides = [1, 1, 1]} : vector<4x8x32xf32> to vector<1x8x32xf32>
    %82 = vector.shape_cast %81 : vector<1x8x32xf32> to vector<8x32xf32>
    %83 = arith.addf %80, %82 : vector<8x32xf32>
    %c0_36 = arith.constant 0 : index
    %c0_37 = arith.constant 0 : index
    %84 = vector.load %arg10[%c0_36, %c0_37] : memref<1x32xf32, #tpu.memory_space<vmem>>, vector<1x32xf32>
    %85 = vector.broadcast %84 : vector<1x32xf32> to vector<8x32xf32>
    %86 = arith.addf %83, %85 : vector<8x32xf32>
    %87 = arith.addf %86, %1 : vector<8x32xf32>
    %cst_38 = arith.constant dense<0.000000e+00> : vector<8xf32>
    %88 = vector.multi_reduction <add>, %87, %cst_38 [1] : vector<8x32xf32> to vector<8xf32>
    %89 = vector.shape_cast %88 : vector<8xf32> to vector<8x1xf32>
    %cst_39 = arith.constant 3.200000e+01 : f32
    %90 = vector.broadcast %cst_39 : f32 to vector<8x1xf32>
    %91 = arith.divf %89, %90 : vector<8x1xf32>
    %92 = vector.broadcast %91 : vector<8x1xf32> to vector<8x32xf32>
    %93 = arith.subf %87, %92 : vector<8x32xf32>
    %94 = arith.mulf %93, %93 : vector<8x32xf32>
    %cst_40 = arith.constant dense<0.000000e+00> : vector<8xf32>
    %95 = vector.multi_reduction <add>, %94, %cst_40 [1] : vector<8x32xf32> to vector<8xf32>
    %96 = vector.shape_cast %95 : vector<8xf32> to vector<8x1xf32>
    %cst_41 = arith.constant 3.200000e+01 : f32
    %97 = vector.broadcast %cst_41 : f32 to vector<8x1xf32>
    %98 = arith.divf %96, %97 : vector<8x1xf32>
    %99 = vector.broadcast %91 : vector<8x1xf32> to vector<8x32xf32>
    %100 = arith.subf %87, %99 : vector<8x32xf32>
    %cst_42 = arith.constant 9.99999974E-6 : f32
    %101 = vector.broadcast %cst_42 : f32 to vector<8x1xf32>
    %102 = arith.addf %98, %101 : vector<8x1xf32>
    %103 = math.rsqrt %102 : vector<8x1xf32>
    %104 = vector.broadcast %103 : vector<8x1xf32> to vector<8x32xf32>
    %105 = arith.mulf %100, %104 : vector<8x32xf32>
    %106 = vector.broadcast %3 : vector<1x32xf32> to vector<8x32xf32>
    %107 = arith.mulf %105, %106 : vector<8x32xf32>
    %108 = vector.broadcast %4 : vector<1x32xf32> to vector<8x32xf32>
    %109 = arith.addf %107, %108 : vector<8x32xf32>
    %110 = arith.truncf %109 : vector<8x32xf32> to vector<8x32xbf16>
    %c0_43 = arith.constant 0 : index
    %c0_44 = arith.constant 0 : index
    %111 = vector.load %arg15[%c0_43, %c0_44] : memref<32x64xbf16, #tpu.memory_space<vmem>>, vector<32x64xbf16>
    %cst_45 = arith.constant dense<0.000000e+00> : vector<8x64xf32>
    %112 = tpu.matmul %110, %111, %cst_45 {dimension_numbers = #tpu.dot_dimension_numbers<[1], [0], [0], [1], [0, 0, 1, 1], [], []>} : vector<8x32xbf16>, vector<32x64xbf16>, vector<8x64xf32> -> vector<8x64xf32>
    %c0_46 = arith.constant 0 : index
    %c0_47 = arith.constant 0 : index
    %113 = vector.load %arg16[%c0_46, %c0_47] : memref<1x64xf32, #tpu.memory_space<vmem>>, vector<1x64xf32>
    %114 = vector.broadcast %113 : vector<1x64xf32> to vector<8x64xf32>
    %115 = arith.addf %112, %114 : vector<8x64xf32>
    %cst_48 = arith.constant 0.000000e+00 : f32
    %116 = vector.broadcast %cst_48 : f32 to vector<8x64xf32>
    %117 = arith.maximumf %115, %116 : vector<8x64xf32>
    %118 = arith.truncf %117 : vector<8x64xf32> to vector<8x64xbf16>
    %c0_49 = arith.constant 0 : index
    %c0_50 = arith.constant 0 : index
    %119 = vector.load %arg17[%c0_49, %c0_50] : memref<64x32xbf16, #tpu.memory_space<vmem>>, vector<64x32xbf16>
    %cst_51 = arith.constant dense<0.000000e+00> : vector<8x32xf32>
    %120 = tpu.matmul %118, %119, %cst_51 {dimension_numbers = #tpu.dot_dimension_numbers<[1], [0], [0], [1], [0, 0, 1, 1], [], []>} : vector<8x64xbf16>, vector<64x32xbf16>, vector<8x32xf32> -> vector<8x32xf32>
    %c0_52 = arith.constant 0 : index
    %c0_53 = arith.constant 0 : index
    %121 = vector.load %arg18[%c0_52, %c0_53] : memref<1x32xf32, #tpu.memory_space<vmem>>, vector<1x32xf32>
    %122 = vector.broadcast %121 : vector<1x32xf32> to vector<8x32xf32>
    %123 = arith.addf %120, %122 : vector<8x32xf32>
    %124 = arith.addf %109, %123 : vector<8x32xf32>
    %cst_54 = arith.constant dense<0.000000e+00> : vector<8xf32>
    %125 = vector.multi_reduction <add>, %124, %cst_54 [1] : vector<8x32xf32> to vector<8xf32>
    %126 = vector.shape_cast %125 : vector<8xf32> to vector<8x1xf32>
    %cst_55 = arith.constant 3.200000e+01 : f32
    %127 = vector.broadcast %cst_55 : f32 to vector<8x1xf32>
    %128 = arith.divf %126, %127 : vector<8x1xf32>
    %129 = vector.broadcast %128 : vector<8x1xf32> to vector<8x32xf32>
    %130 = arith.subf %124, %129 : vector<8x32xf32>
    %131 = arith.mulf %130, %130 : vector<8x32xf32>
    %cst_56 = arith.constant dense<0.000000e+00> : vector<8xf32>
    %132 = vector.multi_reduction <add>, %131, %cst_56 [1] : vector<8x32xf32> to vector<8xf32>
    %133 = vector.shape_cast %132 : vector<8xf32> to vector<8x1xf32>
    %cst_57 = arith.constant 3.200000e+01 : f32
    %134 = vector.broadcast %cst_57 : f32 to vector<8x1xf32>
    %135 = arith.divf %133, %134 : vector<8x1xf32>
    %136 = vector.broadcast %128 : vector<8x1xf32> to vector<8x32xf32>
    %137 = arith.subf %124, %136 : vector<8x32xf32>
    %cst_58 = arith.constant 9.99999974E-6 : f32
    %138 = vector.broadcast %cst_58 : f32 to vector<8x1xf32>
    %139 = arith.addf %135, %138 : vector<8x1xf32>
    %140 = math.rsqrt %139 : vector<8x1xf32>
    %141 = vector.broadcast %140 : vector<8x1xf32> to vector<8x32xf32>
    %142 = arith.mulf %137, %141 : vector<8x32xf32>
    %143 = vector.broadcast %5 : vector<1x32xf32> to vector<8x32xf32>
    %144 = arith.mulf %142, %143 : vector<8x32xf32>
    %145 = vector.broadcast %6 : vector<1x32xf32> to vector<8x32xf32>
    %146 = arith.addf %144, %145 : vector<8x32xf32>
    %c0_59 = arith.constant 0 : index
    %c0_60 = arith.constant 0 : index
    %c0_61 = arith.constant 0 : index
    %147 = vector.load %arg19[%c0_59, %c0_60, %c0_61] : memref<1x8x32xf32, #tpu.memory_space<vmem>>, vector<1x8x32xf32>
    %148 = vector.shape_cast %147 : vector<1x8x32xf32> to vector<8x32xf32>
    %149 = vector.shape_cast %146 : vector<8x32xf32> to vector<1x8x32xf32>
    tpu.vector_store %arg19[%c0_59, %c0_60, %c0_61], %149 {strides = array<i32>} : memref<1x8x32xf32, #tpu.memory_space<vmem>>, vector<1x8x32xf32>,
    return
  }
  func.func @transform_0(%arg0: i32) -> (i32, i32, i32) {
    %c0_i32 = arith.constant 0 : i32
    %c0_i32_0 = arith.constant 0 : i32
    %c0_i32_1 = arith.constant 0 : i32
    return %arg0, %c0_i32, %c0_i32_0 : i32, i32, i32
  }
  func.func @transform_1(%arg0: i32) -> (i32, i32, i32) {
    %c0_i32 = arith.constant 0 : i32
    %c0_i32_0 = arith.constant 0 : i32
    %c0_i32_1 = arith.constant 0 : i32
    return %arg0, %c0_i32, %c0_i32_0 : i32, i32, i32
  }
  func.func @transform_2(%arg0: i32) -> (i32, i32) {
    %c0_i32 = arith.constant 0 : i32
    %c0_i32_0 = arith.constant 0 : i32
    %c0_i32_1 = arith.constant 0 : i32
    return %c0_i32, %c0_i32_0 : i32, i32
  }
  func.func @transform_3(%arg0: i32) -> (i32, i32) {
    %c0_i32 = arith.constant 0 : i32
    %c0_i32_0 = arith.constant 0 : i32
    %c0_i32_1 = arith.constant 0 : i32
    return %c0_i32, %c0_i32_0 : i32, i32
  }
  func.func @transform_4(%arg0: i32) -> (i32, i32) {
    %c0_i32 = arith.constant 0 : i32
    %c0_i32_0 = arith.constant 0 : i32
    %c0_i32_1 = arith.constant 0 : i32
    return %c0_i32, %c0_i32_0 : i32, i32
  }
  func.func @transform_5(%arg0: i32) -> (i32, i32) {
    %c0_i32 = arith.constant 0 : i32
    %c0_i32_0 = arith.constant 0 : i32
    %c0_i32_1 = arith.constant 0 : i32
    return %c0_i32, %c0_i32_0 : i32, i32
  }
  func.func @transform_6(%arg0: i32) -> (i32, i32) {
    %c0_i32 = arith.constant 0 : i32
    %c0_i32_0 = arith.constant 0 : i32
    %c0_i32_1 = arith.constant 0 : i32
    return %c0_i32, %c0_i32_0 : i32, i32
  }
  func.func @transform_7(%arg0: i32) -> (i32, i32) {
    %c0_i32 = arith.constant 0 : i32
    %c0_i32_0 = arith.constant 0 : i32
    %c0_i32_1 = arith.constant 0 : i32
    return %c0_i32, %c0_i32_0 : i32, i32
  }
  func.func @transform_8(%arg0: i32) -> (i32, i32, i32) {
    %c0_i32 = arith.constant 0 : i32
    %c0_i32_0 = arith.constant 0 : i32
    %c0_i32_1 = arith.constant 0 : i32
    %c0_i32_2 = arith.constant 0 : i32
    return %c0_i32, %c0_i32_0, %c0_i32_1 : i32, i32, i32
  }
  func.func @transform_9(%arg0: i32) -> (i32, i32) {
    %c0_i32 = arith.constant 0 : i32
    %c0_i32_0 = arith.constant 0 : i32
    %c0_i32_1 = arith.constant 0 : i32
    return %c0_i32, %c0_i32_0 : i32, i32
  }
  func.func @transform_10(%arg0: i32) -> (i32, i32) {
    %c0_i32 = arith.constant 0 : i32
    %c0_i32_0 = arith.constant 0 : i32
    %c0_i32_1 = arith.constant 0 : i32
    return %c0_i32, %c0_i32_0 : i32, i32
  }
  func.func @transform_11(%arg0: i32) -> (i32, i32) {
    %c0_i32 = arith.constant 0 : i32
    %c0_i32_0 = arith.constant 0 : i32
    %c0_i32_1 = arith.constant 0 : i32
    return %c0_i32, %c0_i32_0 : i32, i32
  }
  func.func @transform_12(%arg0: i32) -> (i32, i32) {
    %c0_i32 = arith.constant 0 : i32
    %c0_i32_0 = arith.constant 0 : i32
    %c0_i32_1 = arith.constant 0 : i32
    return %c0_i32, %c0_i32_0 : i32, i32
  }
  func.func @transform_13(%arg0: i32) -> (i32, i32) {
    %c0_i32 = arith.constant 0 : i32
    %c0_i32_0 = arith.constant 0 : i32
    %c0_i32_1 = arith.constant 0 : i32
    return %c0_i32, %c0_i32_0 : i32, i32
  }
  func.func @transform_14(%arg0: i32) -> (i32, i32) {
    %c0_i32 = arith.constant 0 : i32
    %c0_i32_0 = arith.constant 0 : i32
    %c0_i32_1 = arith.constant 0 : i32
    return %c0_i32, %c0_i32_0 : i32, i32
  }
  func.func @transform_15(%arg0: i32) -> (i32, i32) {
    %c0_i32 = arith.constant 0 : i32
    %c0_i32_0 = arith.constant 0 : i32
    %c0_i32_1 = arith.constant 0 : i32
    return %c0_i32, %c0_i32_0 : i32, i32
  }
  func.func @transform_16(%arg0: i32) -> (i32, i32) {
    %c0_i32 = arith.constant 0 : i32
    %c0_i32_0 = arith.constant 0 : i32
    %c0_i32_1 = arith.constant 0 : i32
    return %c0_i32, %c0_i32_0 : i32, i32
  }
  func.func @transform_17(%arg0: i32) -> (i32, i32) {
    %c0_i32 = arith.constant 0 : i32
    %c0_i32_0 = arith.constant 0 : i32
    %c0_i32_1 = arith.constant 0 : i32
    return %c0_i32, %c0_i32_0 : i32, i32
  }
  func.func @transform_18(%arg0: i32) -> (i32, i32, i32) {
    %c0_i32 = arith.constant 0 : i32
    %c0_i32_0 = arith.constant 0 : i32
    %c0_i32_1 = arith.constant 0 : i32
    return %arg0, %c0_i32, %c0_i32_0 : i32, i32, i32
  }
}

module attributes {stable_mosaic.version = 11 : i64} {
  func.func @kernel(%arg0: i32, %arg1: memref<1x8x32xf32, #tpu.memory_space<vmem>>, %arg2: memref<1x1x8xf32, #tpu.memory_space<vmem>>, %arg3: memref<32x32xbf16, #tpu.memory_space<vmem>>, %arg4: memref<1x32xf32, #tpu.memory_space<vmem>>, %arg5: memref<32x32xbf16, #tpu.memory_space<vmem>>, %arg6: memref<1x32xf32, #tpu.memory_space<vmem>>, %arg7: memref<32x32xbf16, #tpu.memory_space<vmem>>, %arg8: memref<1x32xf32, #tpu.memory_space<vmem>>, %arg9: memref<4x8x32xbf16, #tpu.memory_space<vmem>>, %arg10: memref<1x32xf32, #tpu.memory_space<vmem>>, %arg11: memref<1x32xf32, #tpu.memory_space<vmem>>, %arg12: memref<1x32xf32, #tpu.memory_space<vmem>>, %arg13: memref<1x32xf32, #tpu.memory_space<vmem>>, %arg14: memref<1x32xf32, #tpu.memory_space<vmem>>, %arg15: memref<32x64xbf16, #tpu.memory_space<vmem>>, %arg16: memref<1x64xf32, #tpu.memory_space<vmem>>, %arg17: memref<64x32xbf16, #tpu.memory_space<vmem>>, %arg18: memref<1x32xf32, #tpu.memory_space<vmem>>, %arg19: memref<1x8x32xf32, #tpu.memory_space<vmem>>) attributes {dimension_semantics = [#tpu.dimension_semantics<parallel>], iteration_bounds = array<i64: 2>, scalar_prefetch = 0 : i64, scratch_operands = 0 : i64, tpu.core_type = #tpu.core_type<tc>, window_params = [{transform_indices = @transform_0, window_bounds = array<i64: 1, 8, 32>}, {transform_indices = @transform_1, window_bounds = array<i64: 1, 1, 8>}, {pipeline_mode = #tpu.pipeline_mode<synchronous>, transform_indices = @transform_2, window_bounds = array<i64: 32, 32>}, {pipeline_mode = #tpu.pipeline_mode<synchronous>, transform_indices = @transform_3, window_bounds = array<i64: 1, 32>}, {pipeline_mode = #tpu.pipeline_mode<synchronous>, transform_indices = @transform_4, window_bounds = array<i64: 32, 32>}, {pipeline_mode = #tpu.pipeline_mode<synchronous>, transform_indices = @transform_5, window_bounds = array<i64: 1, 32>}, {pipeline_mode = #tpu.pipeline_mode<synchronous>, transform_indices = @transform_6, window_bounds = array<i64: 32, 32>}, {pipeline_mode = #tpu.pipeline_mode<synchronous>, transform_indices = @transform_7, window_bounds = array<i64: 1, 32>}, {pipeline_mode = #tpu.pipeline_mode<synchronous>, transform_indices = @transform_8, window_bounds = array<i64: 4, 8, 32>}, {pipeline_mode = #tpu.pipeline_mode<synchronous>, transform_indices = @transform_9, window_bounds = array<i64: 1, 32>}, {pipeline_mode = #tpu.pipeline_mode<synchronous>, transform_indices = @transform_10, window_bounds = array<i64: 1, 32>}, {pipeline_mode = #tpu.pipeline_mode<synchronous>, transform_indices = @transform_11, window_bounds = array<i64: 1, 32>}, {pipeline_mode = #tpu.pipeline_mode<synchronous>, transform_indices = @transform_12, window_bounds = array<i64: 1, 32>}, {pipeline_mode = #tpu.pipeline_mode<synchronous>, transform_indices = @transform_13, window_bounds = array<i64: 1, 32>}, {pipeline_mode = #tpu.pipeline_mode<synchronous>, transform_indices = @transform_14, window_bounds = array<i64: 32, 64>}, {pipeline_mode = #tpu.pipeline_mode<synchronous>, transform_indices = @transform_15, window_bounds = array<i64: 1, 64>}, {pipeline_mode = #tpu.pipeline_mode<synchronous>, transform_indices = @transform_16, window_bounds = array<i64: 64, 32>}, {pipeline_mode = #tpu.pipeline_mode<synchronous>, transform_indices = @transform_17, window_bounds = array<i64: 1, 32>}, {transform_indices = @transform_18, window_bounds = array<i64: 1, 8, 32>}]} {
    %c0 = arith.constant 0 : index
    %c0_0 = arith.constant 0 : index
    %c0_1 = arith.constant 0 : index
    %0 = vector.load %arg1[%c0, %c0_0, %c0_1] : memref<1x8x32xf32, #tpu.memory_space<vmem>>, vector<1x8x32xf32>
    %1 = vector.shape_cast %0 : vector<1x8x32xf32> to vector<8x32xf32>
    %c0_2 = arith.constant 0 : index
    %c0_3 = arith.constant 0 : index
    %c0_4 = arith.constant 0 : index
    %2 = vector.load %arg2[%c0_2, %c0_3, %c0_4] : memref<1x1x8xf32, #tpu.memory_space<vmem>>, vector<1x1x8xf32>
    %c0_5 = arith.constant 0 : index
    %c0_6 = arith.constant 0 : index
    %3 = vector.load %arg11[%c0_5, %c0_6] : memref<1x32xf32, #tpu.memory_space<vmem>>, vector<1x32xf32>
    %c0_7 = arith.constant 0 : index
    %c0_8 = arith.constant 0 : index
    %4 = vector.load %arg12[%c0_7, %c0_8] : memref<1x32xf32, #tpu.memory_space<vmem>>, vector<1x32xf32>
    %c0_9 = arith.constant 0 : index
    %c0_10 = arith.constant 0 : index
    %5 = vector.load %arg13[%c0_9, %c0_10] : memref<1x32xf32, #tpu.memory_space<vmem>>, vector<1x32xf32>
    %c0_11 = arith.constant 0 : index
    %c0_12 = arith.constant 0 : index
    %6 = vector.load %arg14[%c0_11, %c0_12] : memref<1x32xf32, #tpu.memory_space<vmem>>, vector<1x32xf32>
    %7 = arith.truncf %1 : vector<8x32xf32> to vector<8x32xbf16>
    %c0_13 = arith.constant 0 : index
    %c0_14 = arith.constant 0 : index
    %8 = vector.load %arg3[%c0_13, %c0_14] : memref<32x32xbf16, #tpu.memory_space<vmem>>, vector<32x32xbf16>
    %cst = arith.constant dense<0.000000e+00> : vector<8x32xf32>
    %9 = tpu.matmul %7, %8, %cst {dimension_numbers = #tpu.dot_dimension_numbers<[1], [0], [0], [1], [0, 0, 1, 1], [], []>} : vector<8x32xbf16>, vector<32x32xbf16>, vector<8x32xf32> -> vector<8x32xf32>
    %c0_15 = arith.constant 0 : index
    %c0_16 = arith.constant 0 : index
    %10 = vector.load %arg4[%c0_15, %c0_16] : memref<1x32xf32, #tpu.memory_space<vmem>>, vector<1x32xf32>
    %11 = vector.broadcast %10 : vector<1x32xf32> to vector<8x32xf32>
    %12 = arith.addf %9, %11 : vector<8x32xf32>
    %c0_17 = arith.constant 0 : index
    %c0_18 = arith.constant 0 : index
    %13 = vector.load %arg5[%c0_17, %c0_18] : memref<32x32xbf16, #tpu.memory_space<vmem>>, vector<32x32xbf16>
    %cst_19 = arith.constant dense<0.000000e+00> : vector<8x32xf32>
    %14 = tpu.matmul %7, %13, %cst_19 {dimension_numbers = #tpu.dot_dimension_numbers<[1], [0], [0], [1], [0, 0, 1, 1], [], []>} : vector<8x32xbf16>, vector<32x32xbf16>, vector<8x32xf32> -> vector<8x32xf32>
    %c0_20 = arith.constant 0 : index
    %c0_21 = arith.constant 0 : index
    %15 = vector.load %arg6[%c0_20, %c0_21] : memref<1x32xf32, #tpu.memory_space<vmem>>, vector<1x32xf32>
    %16 = vector.broadcast %15 : vector<1x32xf32> to vector<8x32xf32>
    %17 = arith.addf %14, %16 : vector<8x32xf32>
    %c0_22 = arith.constant 0 : index
    %c0_23 = arith.constant 0 : index
    %18 = vector.load %arg7[%c0_22, %c0_23] : memref<32x32xbf16, #tpu.memory_space<vmem>>, vector<32x32xbf16>
    %cst_24 = arith.constant dense<0.000000e+00> : vector<8x32xf32>
    %19 = tpu.matmul %7, %18, %cst_24 {dimension_numbers = #tpu.dot_dimension_numbers<[1], [0], [0], [1], [0, 0, 1, 1], [], []>} : vector<8x32xbf16>, vector<32x32xbf16>, vector<8x32xf32> -> vector<8x32xf32>
    %c0_25 = arith.constant 0 : index
    %c0_26 = arith.constant 0 : index
    %20 = vector.load %arg8[%c0_25, %c0_26] : memref<1x32xf32, #tpu.memory_space<vmem>>, vector<1x32xf32>
    %21 = vector.broadcast %20 : vector<1x32xf32> to vector<8x32xf32>
    %22 = arith.addf %19, %21 : vector<8x32xf32>
    %cst_27 = arith.constant 0.353553385 : f32
    %23 = vector.broadcast %cst_27 : f32 to vector<8x32xf32>
    %24 = arith.mulf %12, %23 : vector<8x32xf32>
    %25 = vector.extract_strided_slice %24 {offsets = [0, 0], sizes = [8, 8], strides = [1, 1]} : vector<8x32xf32> to vector<8x8xf32>
    %26 = vector.extract_strided_slice %24 {offsets = [0, 8], sizes = [8, 8], strides = [1, 1]} : vector<8x32xf32> to vector<8x8xf32>
    %27 = vector.extract_strided_slice %24 {offsets = [0, 16], sizes = [8, 8], strides = [1, 1]} : vector<8x32xf32> to vector<8x8xf32>
    %28 = vector.extract_strided_slice %24 {offsets = [0, 24], sizes = [8, 8], strides = [1, 1]} : vector<8x32xf32> to vector<8x8xf32>
    %29 = vector.shape_cast %25 : vector<8x8xf32> to vector<1x8x8xf32>
    %30 = vector.shape_cast %26 : vector<8x8xf32> to vector<1x8x8xf32>
    %31 = vector.shape_cast %27 : vector<8x8xf32> to vector<1x8x8xf32>
    %32 = vector.shape_cast %28 : vector<8x8xf32> to vector<1x8x8xf32>
    %33 = tpu.concatenate %29, %30, %31, %32 in 0 : vector<1x8x8xf32>, vector<1x8x8xf32>, vector<1x8x8xf32>, vector<1x8x8xf32> -> vector<4x8x8xf32>
    %34 = arith.truncf %33 : vector<4x8x8xf32> to vector<4x8x8xbf16>
    %35 = vector.extract_strided_slice %17 {offsets = [0, 0], sizes = [8, 8], strides = [1, 1]} : vector<8x32xf32> to vector<8x8xf32>
    %36 = vector.extract_strided_slice %17 {offsets = [0, 8], sizes = [8, 8], strides = [1, 1]} : vector<8x32xf32> to vector<8x8xf32>
    %37 = vector.extract_strided_slice %17 {offsets = [0, 16], sizes = [8, 8], strides = [1, 1]} : vector<8x32xf32> to vector<8x8xf32>
    %38 = vector.extract_strided_slice %17 {offsets = [0, 24], sizes = [8, 8], strides = [1, 1]} : vector<8x32xf32> to vector<8x8xf32>
    %39 = vector.shape_cast %35 : vector<8x8xf32> to vector<1x8x8xf32>
    %40 = vector.shape_cast %36 : vector<8x8xf32> to vector<1x8x8xf32>
    %41 = vector.shape_cast %37 : vector<8x8xf32> to vector<1x8x8xf32>
    %42 = vector.shape_cast %38 : vector<8x8xf32> to vector<1x8x8xf32>
    %43 = tpu.concatenate %39, %40, %41, %42 in 0 : vector<1x8x8xf32>, vector<1x8x8xf32>, vector<1x8x8xf32>, vector<1x8x8xf32> -> vector<4x8x8xf32>
    %44 = arith.truncf %43 : vector<4x8x8xf32> to vector<4x8x8xbf16>
    %45 = vector.extract_strided_slice %22 {offsets = [0, 0], sizes = [8, 8], strides = [1, 1]} : vector<8x32xf32> to vector<8x8xf32>
    %46 = vector.extract_strided_slice %22 {offsets = [0, 8], sizes = [8, 8], strides = [1, 1]} : vector<8x32xf32> to vector<8x8xf32>
    %47 = vector.extract_strided_slice %22 {offsets = [0, 16], sizes = [8, 8], strides = [1, 1]} : vector<8x32xf32> to vector<8x8xf32>
    %48 = vector.extract_strided_slice %22 {offsets = [0, 24], sizes = [8, 8], strides = [1, 1]} : vector<8x32xf32> to vector<8x8xf32>
    %49 = vector.shape_cast %45 : vector<8x8xf32> to vector<1x8x8xf32>
    %50 = vector.shape_cast %46 : vector<8x8xf32> to vector<1x8x8xf32>
    %51 = vector.shape_cast %47 : vector<8x8xf32> to vector<1x8x8xf32>
    %52 = vector.shape_cast %48 : vector<8x8xf32> to vector<1x8x8xf32>
    %53 = tpu.concatenate %49, %50, %51, %52 in 0 : vector<1x8x8xf32>, vector<1x8x8xf32>, vector<1x8x8xf32>, vector<1x8x8xf32> -> vector<4x8x8xf32>
    %54 = arith.truncf %53 : vector<4x8x8xf32> to vector<4x8x8xbf16>
    "tpu.trace_start"() <{level = 10 : i32, message = "hqd,hkd->hqk"}> : () -> ()
    %cst_28 = arith.constant dense<0.000000e+00> : vector<4x8x8xf32>
    %55 = tpu.matmul %34, %44, %cst_28 {dimension_numbers = #tpu.dot_dimension_numbers<[2], [2], [1], [1], [0, 0, 0, 1, 1, 1], [0], [0]>} : vector<4x8x8xbf16>, vector<4x8x8xbf16>, vector<4x8x8xf32> -> vector<4x8x8xf32>
    "tpu.trace_stop"() : () -> ()
    %56 = vector.broadcast %2 : vector<1x1x8xf32> to vector<4x8x8xf32>
    %57 = arith.addf %55, %56 : vector<4x8x8xf32>
    %cst_29 = arith.constant dense<0xFF800000> : vector<4x8xf32>
    %58 = vector.multi_reduction <maximumf>, %57, %cst_29 [2] : vector<4x8x8xf32> to vector<4x8xf32>
    %59 = vector.shape_cast %58 : vector<4x8xf32> to vector<4x8x1xf32>
    %60 = vector.broadcast %59 : vector<4x8x1xf32> to vector<4x8x8xf32>
    %61 = arith.subf %57, %60 : vector<4x8x8xf32>
    %62 = math.exp %61 : vector<4x8x8xf32>
    %cst_30 = arith.constant dense<0.000000e+00> : vector<4x8xf32>
    %63 = vector.multi_reduction <add>, %62, %cst_30 [2] : vector<4x8x8xf32> to vector<4x8xf32>
    %64 = vector.shape_cast %63 : vector<4x8xf32> to vector<4x8x1xf32>
    %65 = tpu.reciprocal %64 {approx = true} : vector<4x8x1xf32> -> vector<4x8x1xf32>
    %66 = vector.broadcast %65 : vector<4x8x1xf32> to vector<4x8x8xf32>
    %67 = arith.mulf %62, %66 : vector<4x8x8xf32>
    %68 = arith.truncf %67 : vector<4x8x8xf32> to vector<4x8x8xbf16>
    "tpu.trace_start"() <{level = 10 : i32, message = "hqk,hkd->hqd"}> : () -> ()
    %cst_31 = arith.constant dense<0.000000e+00> : vector<4x8x8xf32>
    %69 = tpu.matmul %68, %54, %cst_31 {dimension_numbers = #tpu.dot_dimension_numbers<[2], [1], [1], [2], [0, 0, 0, 1, 1, 2], [0], [0]>} : vector<4x8x8xbf16>, vector<4x8x8xbf16>, vector<4x8x8xf32> -> vector<4x8x8xf32>
    "tpu.trace_stop"() : () -> ()
    %70 = arith.truncf %69 : vector<4x8x8xf32> to vector<4x8x8xbf16>
    %c0_32 = arith.constant 0 : index
    %c0_33 = arith.constant 0 : index
    %c0_34 = arith.constant 0 : index
    %71 = vector.load %arg9[%c0_32, %c0_33, %c0_34] : memref<4x8x32xbf16, #tpu.memory_space<vmem>>, vector<4x8x32xbf16>
    "tpu.trace_start"() <{level = 10 : i32, message = "hqd,hdo->hqo"}> : () -> ()
    %cst_35 = arith.constant dense<0.000000e+00> : vector<4x8x32xf32>
    %72 = tpu.matmul %70, %71, %cst_35 {dimension_numbers = #tpu.dot_dimension_numbers<[2], [1], [1], [2], [0, 0, 0, 1, 1, 2], [0], [0]>} : vector<4x8x8xbf16>, vector<4x8x32xbf16>, vector<4x8x32xf32> -> vector<4x8x32xf32>
    "tpu.trace_stop"() : () -> ()
    %73 = vector.extract_strided_slice %72 {offsets = [0, 0, 0], sizes = [1, 8, 32], strides = [1, 1, 1]} : vector<4x8x32xf32> to vector<1x8x32xf32>
    %74 = vector.shape_cast %73 : vector<1x8x32xf32> to vector<8x32xf32>
    %75 = vector.extract_strided_slice %72 {offsets = [1, 0, 0], sizes = [1, 8, 32], strides = [1, 1, 1]} : vector<4x8x32xf32> to vector<1x8x32xf32>
    %76 = vector.shape_cast %75 : vector<1x8x32xf32> to vector<8x32xf32>
    %77 = arith.addf %74, %76 : vector<8x32xf32>
    %78 = vector.extract_strided_slice %72 {offsets = [2, 0, 0], sizes = [1, 8, 32], strides = [1, 1, 1]} : vector<4x8x32xf32> to vector<1x8x32xf32>
    %79 = vector.shape_cast %78 : vector<1x8x32xf32> to vector<8x32xf32>
    %80 = arith.addf %77, %79 : vector<8x32xf32>
    %81 = vector.extract_strided_slice %72 {offsets = [3, 0, 0], sizes = [1, 8, 32], strides = [1, 1, 1]} : vector<4x8x32xf32> to vector<1x8x32xf32>
    %82 = vector.shape_cast %81 : vector<1x8x32xf32> to vector<8x32xf32>
    %83 = arith.addf %80, %82 : vector<8x32xf32>
    %c0_36 = arith.constant 0 : index
    %c0_37 = arith.constant 0 : index
    %84 = vector.load %arg10[%c0_36, %c0_37] : memref<1x32xf32, #tpu.memory_space<vmem>>, vector<1x32xf32>
    %85 = vector.broadcast %84 : vector<1x32xf32> to vector<8x32xf32>
    %86 = arith.addf %83, %85 : vector<8x32xf32>
    %87 = arith.addf %86, %1 : vector<8x32xf32>
    %cst_38 = arith.constant dense<0.000000e+00> : vector<8xf32>
    %88 = vector.multi_reduction <add>, %87, %cst_38 [1] : vector<8x32xf32> to vector<8xf32>
    %89 = vector.shape_cast %88 : vector<8xf32> to vector<8x1xf32>
    %cst_39 = arith.constant 3.200000e+01 : f32
    %90 = vector.broadcast %cst_39 : f32 to vector<8x1xf32>
    %91 = arith.divf %89, %90 : vector<8x1xf32>
    %92 = vector.broadcast %91 : vector<8x1xf32> to vector<8x32xf32>
    %93 = arith.subf %87, %92 : vector<8x32xf32>
    %94 = arith.mulf %93, %93 : vector<8x32xf32>
    %cst_40 = arith.constant dense<0.000000e+00> : vector<8xf32>
    %95 = vector.multi_reduction <add>, %94, %cst_40 [1] : vector<8x32xf32> to vector<8xf32>
    %96 = vector.shape_cast %95 : vector<8xf32> to vector<8x1xf32>
    %cst_41 = arith.constant 3.200000e+01 : f32
    %97 = vector.broadcast %cst_41 : f32 to vector<8x1xf32>
    %98 = arith.divf %96, %97 : vector<8x1xf32>
    %99 = vector.broadcast %91 : vector<8x1xf32> to vector<8x32xf32>
    %100 = arith.subf %87, %99 : vector<8x32xf32>
    %cst_42 = arith.constant 9.99999974E-6 : f32
    %101 = vector.broadcast %cst_42 : f32 to vector<8x1xf32>
    %102 = arith.addf %98, %101 : vector<8x1xf32>
    %103 = math.rsqrt %102 : vector<8x1xf32>
    %104 = vector.broadcast %103 : vector<8x1xf32> to vector<8x32xf32>
    %105 = arith.mulf %100, %104 : vector<8x32xf32>
    %106 = vector.broadcast %3 : vector<1x32xf32> to vector<8x32xf32>
    %107 = arith.mulf %105, %106 : vector<8x32xf32>
    %108 = vector.broadcast %4 : vector<1x32xf32> to vector<8x32xf32>
    %109 = arith.addf %107, %108 : vector<8x32xf32>
    %110 = arith.truncf %109 : vector<8x32xf32> to vector<8x32xbf16>
    %c0_43 = arith.constant 0 : index
    %c0_44 = arith.constant 0 : index
    %111 = vector.load %arg15[%c0_43, %c0_44] : memref<32x64xbf16, #tpu.memory_space<vmem>>, vector<32x64xbf16>
    %cst_45 = arith.constant dense<0.000000e+00> : vector<8x64xf32>
    %112 = tpu.matmul %110, %111, %cst_45 {dimension_numbers = #tpu.dot_dimension_numbers<[1], [0], [0], [1], [0, 0, 1, 1], [], []>} : vector<8x32xbf16>, vector<32x64xbf16>, vector<8x64xf32> -> vector<8x64xf32>
    %c0_46 = arith.constant 0 : index
    %c0_47 = arith.constant 0 : index
    %113 = vector.load %arg16[%c0_46, %c0_47] : memref<1x64xf32, #tpu.memory_space<vmem>>, vector<1x64xf32>
    %114 = vector.broadcast %113 : vector<1x64xf32> to vector<8x64xf32>
    %115 = arith.addf %112, %114 : vector<8x64xf32>
    %cst_48 = arith.constant 0.000000e+00 : f32
    %116 = vector.broadcast %cst_48 : f32 to vector<8x64xf32>
    %117 = arith.maximumf %115, %116 : vector<8x64xf32>
    %118 = arith.truncf %117 : vector<8x64xf32> to vector<8x64xbf16>
    %c0_49 = arith.constant 0 : index
    %c0_50 = arith.constant 0 : index
    %119 = vector.load %arg17[%c0_49, %c0_50] : memref<64x32xbf16, #tpu.memory_space<vmem>>, vector<64x32xbf16>
    %cst_51 = arith.constant dense<0.000000e+00> : vector<8x32xf32>
    %120 = tpu.matmul %118, %119, %cst_51 {dimension_numbers = #tpu.dot_dimension_numbers<[1], [0], [0], [1], [0, 0, 1, 1], [], []>} : vector<8x64xbf16>, vector<64x32xbf16>, vector<8x32xf32> -> vector<8x32xf32>
    %c0_52 = arith.constant 0 : index
    %c0_53 = arith.constant 0 : index
    %121 = vector.load %arg18[%c0_52, %c0_53] : memref<1x32xf32, #tpu.memory_space<vmem>>, vector<1x32xf32>
    %122 = vector.broadcast %121 : vector<1x32xf32> to vector<8x32xf32>
    %123 = arith.addf %120, %122 : vector<8x32xf32>
    %124 = arith.addf %109, %123 : vector<8x32xf32>
    %cst_54 = arith.constant dense<0.000000e+00> : vector<8xf32>
    %125 = vector.multi_reduction <add>, %124, %cst_54 [1] : vector<8x32xf32> to vector<8xf32>
    %126 = vector.shape_cast %125 : vector<8xf32> to vector<8x1xf32>
    %cst_55 = arith.constant 3.200000e+01 : f32
    %127 = vector.broadcast %cst_55 : f32 to vector<8x1xf32>
    %128 = arith.divf %126, %127 : vector<8x1xf32>
    %129 = vector.broadcast %128 : vector<8x1xf32> to vector<8x32xf32>
    %130 = arith.subf %124, %129 : vector<8x32xf32>
    %131 = arith.mulf %130, %130 : vector<8x32xf32>
    %cst_56 = arith.constant dense<0.000000e+00> : vector<8xf32>
    %132 = vector.multi_reduction <add>, %131, %cst_56 [1] : vector<8x32xf32> to vector<8xf32>
    %133 = vector.shape_cast %132 : vector<8xf32> to vector<8x1xf32>
    %cst_57 = arith.constant 3.200000e+01 : f32
    %134 = vector.broadcast %cst_57 : f32 to vector<8x1xf32>
    %135 = arith.divf %133, %134 : vector<8x1xf32>
    %136 = vector.broadcast %128 : vector<8x1xf32> to vector<8x32xf32>
    %137 = arith.subf %124, %136 : vector<8x32xf32>
    %cst_58 = arith.constant 9.99999974E-6 : f32
    %138 = vector.broadcast %cst_58 : f32 to vector<8x1xf32>
    %139 = arith.addf %135, %138 : vector<8x1xf32>
    %140 = math.rsqrt %139 : vector<8x1xf32>
    %141 = vector.broadcast %140 : vector<8x1xf32> to vector<8x32xf32>
    %142 = arith.mulf %137, %141 : vector<8x32xf32>
    %143 = vector.broadcast %5 : vector<1x32xf32> to vector<8x32xf32>
    %144 = arith.mulf %142, %143 : vector<8x32xf32>
    %145 = vector.broadcast %6 : vector<1x32xf32> to vector<8x32xf32>
    %146 = arith.addf %144, %145 : vector<8x32xf32>
    %c0_59 = arith.constant 0 : index
    %c0_60 = arith.constant 0 : index
    %c0_61 = arith.constant 0 : index
    %147 = vector.load %arg19[%c0_59, %c0_60, %c0_61] : memref<1x8x32xf32, #tpu.memory_space<vmem>>, vector<1x8x32xf32>
    %148 = vector.shape_cast %147 : vector<1x8x32xf32> to vector<8x32xf32>
    %149 = vector.shape_cast %146 : vector<8x32xf32> to vector<1x8x32xf32>
    tpu.vector_store %arg19[%c0_59, %c0_60, %c0_61], %149 {strides = array<i32>} : memref<1x8x32xf32, #tpu.memory_space<vmem>>, vector<1x8x32xf32>,
    return
  }
  func.func @transform_0(%arg0: i32) -> (i32, i32, i32) {
    %c0_i32 = arith.constant 0 : i32
    %c0_i32_0 = arith.constant 0 : i32
    %c0_i32_1 = arith.constant 0 : i32
    return %arg0, %c0_i32, %c0_i32_0 : i32, i32, i32
  }
  func.func @transform_1(%arg0: i32) -> (i32, i32, i32) {
    %c0_i32 = arith.constant 0 : i32
    %c0_i32_0 = arith.constant 0 : i32
    %c0_i32_1 = arith.constant 0 : i32
    return %arg0, %c0_i32, %c0_i32_0 : i32, i32, i32
  }
  func.func @transform_2(%arg0: i32) -> (i32, i32) {
    %c0_i32 = arith.constant 0 : i32
    %c0_i32_0 = arith.constant 0 : i32
    %c0_i32_1 = arith.constant 0 : i32
    return %c0_i32, %c0_i32_0 : i32, i32
  }
  func.func @transform_3(%arg0: i32) -> (i32, i32) {
    %c0_i32 = arith.constant 0 : i32
    %c0_i32_0 = arith.constant 0 : i32
    %c0_i32_1 = arith.constant 0 : i32
    return %c0_i32, %c0_i32_0 : i32, i32
  }
  func.func @transform_4(%arg0: i32) -> (i32, i32) {
    %c0_i32 = arith.constant 0 : i32
    %c0_i32_0 = arith.constant 0 : i32
    %c0_i32_1 = arith.constant 0 : i32
    return %c0_i32, %c0_i32_0 : i32, i32
  }
  func.func @transform_5(%arg0: i32) -> (i32, i32) {
    %c0_i32 = arith.constant 0 : i32
    %c0_i32_0 = arith.constant 0 : i32
    %c0_i32_1 = arith.constant 0 : i32
    return %c0_i32, %c0_i32_0 : i32, i32
  }
  func.func @transform_6(%arg0: i32) -> (i32, i32) {
    %c0_i32 = arith.constant 0 : i32
    %c0_i32_0 = arith.constant 0 : i32
    %c0_i32_1 = arith.constant 0 : i32
    return %c0_i32, %c0_i32_0 : i32, i32
  }
  func.func @transform_7(%arg0: i32) -> (i32, i32) {
    %c0_i32 = arith.constant 0 : i32
    %c0_i32_0 = arith.constant 0 : i32
    %c0_i32_1 = arith.constant 0 : i32
    return %c0_i32, %c0_i32_0 : i32, i32
  }
  func.func @transform_8(%arg0: i32) -> (i32, i32, i32) {
    %c0_i32 = arith.constant 0 : i32
    %c0_i32_0 = arith.constant 0 : i32
    %c0_i32_1 = arith.constant 0 : i32
    %c0_i32_2 = arith.constant 0 : i32
    return %c0_i32, %c0_i32_0, %c0_i32_1 : i32, i32, i32
  }
  func.func @transform_9(%arg0: i32) -> (i32, i32) {
    %c0_i32 = arith.constant 0 : i32
    %c0_i32_0 = arith.constant 0 : i32
    %c0_i32_1 = arith.constant 0 : i32
    return %c0_i32, %c0_i32_0 : i32, i32
  }
  func.func @transform_10(%arg0: i32) -> (i32, i32) {
    %c0_i32 = arith.constant 0 : i32
    %c0_i32_0 = arith.constant 0 : i32
    %c0_i32_1 = arith.constant 0 : i32
    return %c0_i32, %c0_i32_0 : i32, i32
  }
  func.func @transform_11(%arg0: i32) -> (i32, i32) {
    %c0_i32 = arith.constant 0 : i32
    %c0_i32_0 = arith.constant 0 : i32
    %c0_i32_1 = arith.constant 0 : i32
    return %c0_i32, %c0_i32_0 : i32, i32
  }
  func.func @transform_12(%arg0: i32) -> (i32, i32) {
    %c0_i32 = arith.constant 0 : i32
    %c0_i32_0 = arith.constant 0 : i32
    %c0_i32_1 = arith.constant 0 : i32
    return %c0_i32, %c0_i32_0 : i32, i32
  }
  func.func @transform_13(%arg0: i32) -> (i32, i32) {
    %c0_i32 = arith.constant 0 : i32
    %c0_i32_0 = arith.constant 0 : i32
    %c0_i32_1 = arith.constant 0 : i32
    return %c0_i32, %c0_i32_0 : i32, i32
  }
  func.func @transform_14(%arg0: i32) -> (i32, i32) {
    %c0_i32 = arith.constant 0 : i32
    %c0_i32_0 = arith.constant 0 : i32
    %c0_i32_1 = arith.constant 0 : i32
    return %c0_i32, %c0_i32_0 : i32, i32
  }
  func.func @transform_15(%arg0: i32) -> (i32, i32) {
    %c0_i32 = arith.constant 0 : i32
    %c0_i32_0 = arith.constant 0 : i32
    %c0_i32_1 = arith.constant 0 : i32
    return %c0_i32, %c0_i32_0 : i32, i32
  }
  func.func @transform_16(%arg0: i32) -> (i32, i32) {
    %c0_i32 = arith.constant 0 : i32
    %c0_i32_0 = arith.constant 0 : i32
    %c0_i32_1 = arith.constant 0 : i32
    return %c0_i32, %c0_i32_0 : i32, i32
  }
  func.func @transform_17(%arg0: i32) -> (i32, i32) {
    %c0_i32 = arith.constant 0 : i32
    %c0_i32_0 = arith.constant 0 : i32
    %c0_i32_1 = arith.constant 0 : i32
    return %c0_i32, %c0_i32_0 : i32, i32
  }
  func.func @transform_18(%arg0: i32) -> (i32, i32, i32) {
    %c0_i32 = arith.constant 0 : i32
    %c0_i32_0 = arith.constant 0 : i32
    %c0_i32_1 = arith.constant 0 : i32
    return %arg0, %c0_i32, %c0_i32_0 : i32, i32, i32
  }
}

</mosaic_0001>

<bundles_post_ra>
// kernel: tpu_custom_call.1
= control target key start
LH: loop header
LB: loop body
LE: loop exit
PB: predicated region body
PF: predicated region fallthrough
CT: control target
= control target key end

     0   :  { %s3050_s0 = inlined_call_operand.vmem [shape: f32[2,8,32], index: 0, kind: input, shape index: {}]   ;;  %s3051_s1 = inlined_call_operand.hbm [shape: f32[2,1,8], index: 1, kind: input, shape index: {}]   ;;  %s3052_s2 = inlined_call_operand.vmem [shape: bf16[32,32], index: 2, kind: input, shape index: {}]   ;;  %s3053_s3 = inlined_call_operand.hbm [shape: f32[1,32], index: 3, kind: input, shape index: {}]   ;;  %s3054_s4 = inlined_call_operand.vmem [shape: bf16[32,32], index: 4, kind: input, shape index: {}]   ;;  %s3055_s5 = inlined_call_operand.hbm [shape: f32[1,32], index: 5, kind: input, shape index: {}]   ;;  %s3056_s6 = inlined_call_operand.hbm [shape: bf16[32,32], index: 6, kind: input, shape index: {}]   ;;  %s3057_s7 = inlined_call_operand.hbm [shape: f32[1,32], index: 7, kind: input, shape index: {}]   ;;  %s3058_s8 = inlined_call_operand.hbm [shape: bf16[4,8,32], index: 8, kind: input, shape index: {}]   ;;  %s3059_s9 = inlined_call_operand.hbm [shape: f32[1,32], index: 9, kind: input, shape index: {}]   ;;  %s3060_s10 = inlined_call_operand.vmem [shape: f32[1,32], index: 10, kind: input, shape index: {}]   ;;  %s3061_s11 = inlined_call_operand.vmem [shape: f32[1,32], index: 11, kind: input, shape index: {}]   ;;  %s3062_s12 = inlined_call_operand.vmem [shape: f32[1,32], index: 12, kind: input, shape index: {}]   ;;  %s3063_s13 = inlined_call_operand.vmem [shape: f32[1,32], index: 13, kind: input, shape index: {}]   ;;  %s3064_s14 = inlined_call_operand.vmem [shape: bf16[32,64], index: 14, kind: input, shape index: {}]   ;;  %s3065_s15 = inlined_call_operand.vmem [shape: f32[1,64], index: 15, kind: input, shape index: {}]   ;;  %s3066_s16 = inlined_call_operand.vmem [shape: bf16[64,32], index: 16, kind: input, shape index: {}]   ;;  %s3067_s17 = inlined_call_operand.vmem [shape: f32[1,32], index: 17, kind: input, shape index: {}]   ;;  %s3068_s18 = inlined_call_operand.hbm [shape: f32[2,8,32], index: 18, kind: output, shape index: {}]  }
   0x1   :  { %3079 = sst [smem:[#allocation23_spill]] %s3050_s0 }
   0x2   :  { %3080 = sst [smem:[#allocation24_spill]] %s3051_s1 }
   0x3   :  { %3081 = sst [smem:[#allocation25_spill]] %s3052_s2 }
   0x4   :  { %3082 = sst [smem:[#allocation26_spill]] %s3053_s3 }
   0x5   :  { %3083 = sst [smem:[#allocation27_spill]] %s3055_s5 }
   0x6   :  { %3084 = sst [smem:[#allocation28_spill]] %s3056_s6 }
   0x7   :  { %3085 = sst [smem:[#allocation29_spill]] %s3057_s7 }
   0x8   :  { %3086 = sst [smem:[#allocation30_spill]] %s3058_s8 }
   0x9   :  { %3087 = sst [smem:[#allocation31_spill]] %s3059_s9 }
   0xa   :  { %3088 = sst [smem:[#allocation32_spill]] %s3063_s13 }
   0xb   :  { %3089 = sst [smem:[#allocation33_spill]] %s3068_s18 }
   0xc   :  { %23 = vsyncpa [#allocation3], 0 }
   0xd   :  { %25 = vsyncpa [#allocation3 + $0x1], 0 }
   0xe   :  { %26 = vsyncpa [#allocation6], 0 }
   0xf   :  { %27 = vsyncpa [#allocation9], 0 }
  0x10   :  { %28 = vsyncpa [#allocation12], 0 }
  0x11   :  { %29 = vsyncpa [#allocation4], 0 }
  0x12   :  { %31 = vsyncpa [#allocation4 + $0x1], 0  ;;  %s2653_s27 = smov 0   ;;  %s2655_s28 = smov 0  }
  0x13   :  { %s2657_s29 = smov 0   ;;  %s2659_s30 = smov 0  }
  0x14 LB: > { %3090 = sst [smem:[#allocation20_spill]] %s2537_s29  ;;  %s2543_s0 = smov [#allocation5]   ;;  %s2541_s30 = sphi %s2659_s30, %s3124_s30   ;;  %s2537_s29 = sphi %s2657_s29, %s3126_s29   ;;  %s2533_s28 = sphi %s2655_s28, %s3128_s28   ;;  %s2529_s27 = sphi %s2653_s27, %s3127_s27  }
  0x15   : > { %s472_s19 = sshll.u32 %s2543_s0, 4  ;;  %s2674_s1 = sadd.s32 4294967295, %s2541_s30   ;;  %s473_s19 = int_to_ptr.vmem [resolvable:$true] %s472_s19 }
  0x16   : > { %p1916_p0 = scmp.ge.s32.totalorder %s2541_s30, 1  ;;  %p3072_p1 = scmp.eq.s32.totalorder %s2674_s1, 0 }
  0x17   : > { %p456_p2 = scmp.lt.s32.totalorder %s2541_s30, 3  ;;  %s2544_s21 = smov [#allocation8]  }
  0x18   : > { %s496_s22 = sshll.u32 %s2544_s21, 4  ;;  %s2545_s23 = smov [#allocation11]   ;;  %s2686_s22 = int_to_ptr.vmem [resolvable:$true] %s496_s22 }
  0x19   : > { %p2679_p3 = pnand %p1916_p0, %p456_p2  ;;  %s520_s24 = sshll.u32 %s2545_s23, 4  ;;  %s2694_s24 = int_to_ptr.vmem [resolvable:$true] %s520_s24 }
  0x1a   : > { %s2292_s26 = scalar_lea.vmem %s473_s19, 16  ;;  %s2299_s0 = scalar_lea.vmem %s473_s19, 32 }
  0x1b   : > { %s3091_s20 = scalar_select %p2679_p3, 1, 0 }
  0x1c   : > { %p2163_p5 = pneg %p2679_p3  ;;  %p2293_p8 = scmp.ne.s32.totalorder %s473_s19, %s2292_s26 }
  0x1d   : > { %p2300_p11 = scmp.lt.s32.totalorder %s473_s19, %s473_s19  ;;  %p2301_p12 = scmp.lt.s32.totalorder %s2299_s0, %s2292_s26 }
  0x1e   : > { %p2690_p6 = pnand %p2163_p5, %p3072_p1 }
  0x1f   : > { %p2302_p13 = por %p2301_p12, %p2300_p11 }
  0x20   : > { %p2698_p7 = pneg %p2690_p6 }
  0x22   : > { %p2295_p9 = pnand %p2293_p8, %p2698_p7 }
  0x24   : > { %p2296_p10 = pneg %p2295_p9 }
  0x26   : > { %p2303_p0 = pnand %p2302_p13, %p2296_p10 }
  0x28   : > { %2306 = shalt.err (!%p2303_p0)
}
  0x29   : > { %s3094_s3 = sld [smem:[#allocation26_spill]]  ;;  %s2318_s18 = scalar_lea.vmem %s2686_s22, 256 }
  0x2a   : > { %p2319_p2 = scmp.ne.s32.totalorder %s2686_s22, %s2318_s18  ;;  %p2326_p9 = scmp.lt.s32.totalorder %s2686_s22, %s2686_s22 }
  0x2b   : > { %p2327_p11 = scmp.lt.s32.totalorder %s2318_s18, %s2318_s18 }
  0x2c   : > { %p2321_p5 = pnand %p2319_p2, %p2698_p7 }
  0x2d   : > { %p2328_p10 = por %p2327_p11, %p2326_p9 }
  0x2e   : > { %p2322_p8 = pneg %p2321_p5 }
  0x2f   : > { %2166 = dma.hbm_to_vmem [thread:$0]  (!%p2690_p6), %s3094_s3, 16, %s473_s19, [#allocation6]  }
  0x30   : > { %p2329_p12 = pnand %p2328_p10, %p2322_p8 }
  0x32   : > { %2332 = shalt.err (!%p2329_p12)
}
  0x33   : > { %s2546_s26 = smov 64   ;;  %s2547_s0 = smov 4  }
  0x34   : > { %s3095_s6 = sld [smem:[#allocation28_spill]]  ;;  %s2344_s23 = scalar_lea.vmem %s2694_s24, 256 }
  0x35   : > { %p2345_p13 = scmp.ne.s32.totalorder %s2694_s24, %s2344_s23  ;;  %p2352_p5 = scmp.lt.s32.totalorder %s2694_s24, %s2694_s24 }
  0x36   : > { %p2353_p8 = scmp.lt.s32.totalorder %s2344_s23, %s2344_s23 }
  0x37   : > { %p2347_p0 = pnand %p2345_p13, %p2698_p7 }
  0x38   : > { %p2354_p9 = por %p2353_p8, %p2352_p5 }
  0x39   : > { %p2348_p2 = pneg %p2347_p0 }
  0x3a   : > { %2172 = dma.hbm_to_vmem [thread:$0]  (!%p2690_p6), %s3095_s6, 256, %s2686_s22, [#allocation9], %s2546_s26, %s2546_s26, %s2547_s0  }
  0x3b   : > { %p2355_p11 = pnand %p2354_p9, %p2348_p2 }
  0x3d   : > { %2358 = shalt.err (!%p2355_p11)
}
  0x3e   : > { %s3096_s8 = sld [smem:[#allocation30_spill]]  ;;  %s2548_s22 = smov [#allocation7]  }
  0x3f   : > { %s486_s19 = sshll.u32 %s2548_s22, 4  ;;  %s2549_s21 = smov [#allocation10]   ;;  %s487_s19 = int_to_ptr.vmem [resolvable:$true] %s486_s19 }
  0x40   : > { %s510_s6 = sshll.u32 %s2549_s21, 4  ;;  %s2370_s13 = scalar_lea.vmem %s487_s19, 16  ;;  %s511_s6 = int_to_ptr.vmem [resolvable:$true] %s510_s6 }
  0x41   : > { %p2371_p10 = scmp.ne.s32.totalorder %s487_s19, %s2370_s13  ;;  %s2377_s23 = scalar_lea.vmem %s487_s19, 32 }
  0x42   : > { %p2378_p0 = scmp.lt.s32.totalorder %s487_s19, %s487_s19  ;;  %p2379_p2 = scmp.lt.s32.totalorder %s2377_s23, %s2370_s13 }
  0x43   : > { %p2373_p12 = pnand %p2371_p10, %p2698_p7 }
  0x44   : > { %2178 = dma.hbm_to_vmem [thread:$0]  (!%p2690_p6), %s3096_s8, 256, %s2694_s24, [#allocation12], %s2546_s26, %s2546_s26, %s2547_s0  }
  0x45   : > { %p2374_p13 = pneg %p2373_p12  ;;  %p2380_p5 = por %p2379_p2, %p2378_p0 }
  0x47   : > { %p2381_p8 = pnand %p2380_p5, %p2374_p13 }
  0x49   : > { %2384 = shalt.err (!%p2381_p8)
}
  0x4a   : > { %s3097_s5 = sld [smem:[#allocation27_spill]]  ;;  %s2396_s26 = scalar_lea.vmem %s511_s6, 16 }
  0x4b   : > { %p2397_p9 = scmp.ne.s32.totalorder %s511_s6, %s2396_s26  ;;  %s2403_s0 = scalar_lea.vmem %s511_s6, 32 }
  0x4c   : > { %p2404_p12 = scmp.lt.s32.totalorder %s511_s6, %s511_s6  ;;  %p2405_p4 = scmp.lt.s32.totalorder %s2403_s0, %s2396_s26 }
  0x4d   : > { %p2399_p11 = pnand %p2397_p9, %p2698_p7 }
  0x4e   : > { %p2406_p1 = por %p2405_p4, %p2404_p12 }
  0x4f   : > { %p2400_p10 = pneg %p2399_p11 }
  0x50   : > { %2169 = dma.hbm_to_vmem [thread:$0]  (!%p2690_p6), %s3097_s5, 16, %s487_s19, [#allocation6]  }
  0x51   : > { %p2407_p0 = pnand %p2406_p1, %p2400_p10 }
  0x53   : > { %2410 = shalt.err (!%p2407_p0)
}
  0x54   : > { %s3098_s7 = sld [smem:[#allocation29_spill]]  ;;  %s2550_s22 = smov [#allocation13]  }
  0x55   : > { %s534_s19 = sshll.u32 %s2550_s22, 4  ;;  %s535_s19 = int_to_ptr.vmem [resolvable:$true] %s534_s19 }
  0x56   : > { %s2422_s21 = scalar_lea.vmem %s535_s19, 16  ;;  %s2429_s23 = scalar_lea.vmem %s535_s19, 32 }
  0x57   : > { %p2423_p13 = scmp.ne.s32.totalorder %s535_s19, %s2422_s21  ;;  %p2430_p8 = scmp.lt.s32.totalorder %s535_s19, %s535_s19 }
  0x58   : > { %p2431_p4 = scmp.lt.s32.totalorder %s2429_s23, %s2422_s21 }
  0x59   : > { %p2425_p2 = pnand %p2423_p13, %p2698_p7 }
  0x5a   : > { %2175 = dma.hbm_to_vmem [thread:$0]  (!%p2690_p6), %s3098_s7, 16, %s511_s6, [#allocation9]  }
  0x5b   : > { %p2426_p5 = pneg %p2425_p2  ;;  %p2432_p1 = por %p2431_p4, %p2430_p8 }
  0x5d   : > { %p2433_p9 = pnand %p2432_p1, %p2426_p5 }
  0x5f   : > { %2436 = shalt.err (!%p2433_p9)
}
  0x60   : > { %s3099_s9 = sld [smem:[#allocation31_spill]]  ;;  %s1915_s6 = sadd.s32 4294967294, %s2541_s30  }
  0x61   : > { %s2756_s2 = sadd.s32 1, %s2541_s30   ;;  %s70_s26 = sadd.s32 1, %s2537_s29 }
  0x62   : > { %3100 = sst [smem:[#allocation21_spill]] %s2756_s2  ;;  %s67_s25 = ssub.s32 %s2541_s30, %s2756_s2 }
  0x63   : > { %p68_p7 = scmp.eq.s32.totalorder %s67_s25, 0  ;;  %p77_p11 = scmp.ne.s32.totalorder %s2537_s29, %s2533_s28 }
  0x64   : > { %p78_p10 = scmp.eq.s32.totalorder %s2541_s30, 0  ;;  %p83_p12 = scmp.ne.s32.totalorder %s2533_s28, %s2529_s27 }
  0x65   : > { %s2767_s0 = scalar_select %p68_p7, %s2537_s29, %s70_s26  }
  0x66   : > { %2181 = dma.hbm_to_vmem [thread:$0]  (!%p2690_p6), %s3099_s9, 16, %s535_s19, [#allocation12]  }
  0x67   : > { %3101 = sst [smem:[#allocation22_spill]] %s2767_s0  ;;  %p2769_p0 = por %p78_p10, %p77_p11 }
  0x68   : > { %p3103_p13 = scmp.eq.s32.totalorder %s2674_s1, 0  ;;  %p443_p2 = scmp.eq.s32.totalorder %s2674_s1, 1 }
  0x69   : > { %p449_p5 = scmp.eq.s32.totalorder %s1915_s6, 1  ;;  %p2196_p8 = scmp.lt.s32.totalorder %s2541_s30, 2 }
  0x6a   : > { %p2775_p6 = por %p3103_p13, %p83_p12  ;;  %s576_s22 = sand.u32 1, %s2537_s29  }
  0x6b   : > { %p2782_p4 = por %p443_p2, %p77_p11  ;;  %p2786_p1 = por %p449_p5, %p83_p12 }
  0x6c   : > { %s3104_s18 = scalar_select %p2775_p6, 1, 0 }
  0x6d   : > { %s3105_s19 = scalar_select %p2782_p4, 1, 0 }
  0x6e   : > { %s3106_s21 = scalar_select %p2786_p1, 1, 0 }
  0x6f   : > { %s1924_s23 = sshll.u32 %s2541_s30, 4  ;;  %s579_s3 = scalar_lea.vmem [#allocation2], %s576_s22 }
  0x70   : > { %s586_s24 = sshll.u32 %s579_s3, 4  ;;  %s3107_s5 = sld [smem:[#allocation24_spill]]  ;;  %s587_s24 = int_to_ptr.vmem [resolvable:$true] %s586_s24 }
  0x71   : > { %p2798_p9 = pnand %p2196_p8, %p2769_p0  ;;  %s577_s8 = scalar_lea.sflag [#allocation3], %s576_s22 }
  0x73   : > { %p2439_p11 = pneg %p2798_p9 }
  0x76   : > { %s2794_s7 = scalar_lea.hbm %s3107_s5, %s1924_s23  ;;  %s2442_s25 = scalar_lea.hbm %s3107_s5, 32 }
  0x77   : > { %s2437_s9 = scalar_lea.hbm %s2794_s7, 16  ;;  %p2443_p13 = scmp.lt.s32.totalorder %s2794_s7, %s3107_s5 }
  0x78   : > { %p2438_p7 = scmp.ne.s32.totalorder %s2794_s7, %s2437_s9  ;;  %p2444_p0 = scmp.lt.s32.totalorder %s2442_s25, %s2437_s9 }
  0x7a   : > { %p2440_p10 = pnand %p2439_p11, %p2438_p7  ;;  %p2445_p2 = por %p2444_p0, %p2443_p13 }
  0x7c   : > { %p2441_p12 = pneg %p2440_p10 }
  0x7e   : > { %p2446_p5 = pnand %p2445_p2, %p2441_p12 }
  0x80   : > { %2449 = shalt.err (!%p2446_p5)
}
  0x81   : > { %s2450_s13 = scalar_lea.vmem %s587_s24, 16  ;;  %s2551_s22 = smov [#allocation2]  }
  0x82   : > { %p2451_p8 = scmp.ne.s32.totalorder %s587_s24, %s2450_s13  ;;  %s2455_s29 = sshll.u32 %s2551_s22, 4  ;;  %s2456_s29 = int_to_ptr.vmem [resolvable:$false] %s2455_s29 }
  0x83   : > { %s2457_s2 = scalar_lea.vmem %s2456_s29, 32  ;;  %p2458_p7 = scmp.lt.s32.totalorder %s587_s24, %s2456_s29 }
  0x84   : > { %p2453_p1 = pnand %p2451_p8, %p2439_p11  ;;  %p2459_p10 = scmp.lt.s32.totalorder %s2457_s2, %s2450_s13 }
  0x86   : > { %p2454_p4 = pneg %p2453_p1  ;;  %p2460_p6 = por %p2459_p10, %p2458_p7 }
  0x88   : > { %p2461_p3 = pnand %p2460_p6, %p2454_p4 }
  0x8a   : > { %2464 = shalt.err (!%p2461_p3)
}
  0x8b   : > { %2185 = dma.hbm_to_vmem [thread:$0]  (!%p2798_p9), %s2794_s7, 16, %s587_s24, %s577_s8  }
  0x8c   : > { %p3109_p12 = scmp.ne.s32.totalorder %s3091_s20, 0 }
  0x8d   : > { %s2819_s9 = sand.u32 (!%p3109_p12), 1, %s2533_s28   ;;  %p3110_p1 = scmp.ne.s32.totalorder (!%p3109_p12), %s3104_s18, 0 }
  0x8e   : > { %595 = sbr.rel (%p3109_p12) target bundleno = 2438 (0x986), region = 92  ;;  %s598_s0 = scalar_lea.sflag (!%p3109_p12), [#allocation3], %s2819_s9 }
  0x8f   : > { %s600_s3 = scalar_lea.vmem (!%p3109_p12), [#allocation2], %s2819_s9 }
  0x93   : > { %2508 = dma.done.wait (%p3110_p1), %s598_s0, 16  }
  0x94   : > { %2510 = vsyncadd (%p3110_p1), %s598_s0, 4294967280  ;;  %p3111_p3 = scmp.eq.s32.totalorder %s2674_s1, 0 }
  0x96   : > { %2512 = dma.done.wait (%p3111_p3), [#allocation6], 32   ;;  %p3112_p6 = pmov %p3111_p3 }
  0x97   : > { %p3113_p4 = pmov %p3111_p3 }
  0x98   : > { %2514 = vsyncadd (%p3112_p6), [#allocation6], 4294967264 }
  0x99   : > { %2516 = dma.done.wait (%p3113_p4), [#allocation9], 272   ;;  %p3114_p9 = pmov %p3111_p3 }
  0x9a   : > { %p3115_p11 = pmov %p3111_p3 }
  0x9b   : > { %2518 = vsyncadd (%p3114_p9), [#allocation9], 4294967024 }
  0x9c   : > { %2520 = dma.done.wait (%p3115_p11), [#allocation12], 272   ;;  %p3116_p13 = pmov %p3111_p3 }
  0x9d   : > { %p680_p0 = scmp.lt.s32.totalorder %s2674_s1, 1  ;;  %v2552_v0 = vmov 0.0   ;;  %vm2553_vm0 = vmmov 0   ;;  %s3117_s2 = sld [smem:[#allocation23_spill]]  ;;  %vm715_vm1 = vcmask 261120   ;;  %v2251_v4 = vld [vmem:[%s3054_s4 + $0x8] sm:$0xff]  }
  0x9e   : > { %2522 = vsyncadd (%p3116_p13), [#allocation12], 4294967024  ;;  %2019 = vmatprep.subr.bf16.mxu1 %v2552_v0  ;;  %2023 = vmatprep.mubr.msk.bf16.mxu1 %vm2553_vm0, %v2552_v0  ;;  %s3118_s23 = sld [smem:[#allocation25_spill]]  ;;  %v2252_v6 = vld [vmem:[%s3054_s4] sm:$0xff]   ;;  %v2253_v7 = vld [vmem:[#allocation8 + $0x8] sm:$0xff]   ;;  %vm934_vm2 = vcmask 64512  }
  0x9f   : > { %s681_s7 = scalar_select %p680_p0, %s2674_s1, 1  ;;  %2035 = vmatprep.subr.bf16.mxu0 %v2552_v0  ;;  %2039 = vmatprep.mubr.msk.bf16.mxu0 %vm2553_vm0, %v2552_v0  ;;  %v2254_v8 = vld [vmem:[#allocation8] sm:$0xff]   ;;  %v1934_v9 = vld [vmem:[#allocation5] ss:$0 sm:$0xff]  ;;  %v1938_v16 = vld [vmem:[#allocation7] ss:$0 sm:$0xff] }
  0xa0   : > { %2036 = vmatpush3.bf16.msra.mxu0 %v2253_v7  ;;  %s2555_s29 = smov 104   ;;  %s2556_s20 = smov 112   ;;  %v1942_v40 = vld [vmem:[#allocation10] ss:$0 sm:$0xff]  ;;  %vm1170_vm3 = vcmask 1043456   ;;  %vm1692_vm4 = vcmask 523264  }
  0xa1   : > { %s1933_s8 = sshll.u32 %s681_s7, 3  ;;  %2037 = vmatprep.subr.bf16.mxu0 %v2552_v0  ;;  %v1946_v48 = vld [vmem:[%s600_s3] ss:$0 sm:$0xff]  ;;  %s1932_s26 = sshll.u32 %s2819_s9, 3 }
  0xa2   : > { %s3120_s24 = sld [smem:[#allocation33_spill]]  ;;  %s1766_s25 = scalar_lea.sflag [#allocation4], %s2819_s9 }
  0xa3   : > { %s683_s18 = scalar_lea.vmem %s3117_s2, %s1933_s8  ;;  %s2554_s8 = smov 120  }
  0xa4   : > { %v2249_v1 = vld [vmem:[%s3118_s23 + $0x8] sm:$0xff]   ;;  %v2250_v2 = vld [vmem:[%s3118_s23] sm:$0xff]   ;;  %2038 = vmatpush3.bf16.msra.mxu0 %v2254_v8  ;;  %p3121_p5 = scmp.ne.s32.totalorder %s3105_s19, 0  ;;  %s2557_s22 = smov [#allocation14]  }
  0xa5   : > { %2020 = vmatpush3.bf16.msra.mxu1 %v2249_v1  ;;  %v2856_v3 = vld [vmem:[%s683_s18] sm:$0xff]  ;;  %2049 = vmatprep.subr.bf16.mxu0 %v2552_v0  ;;  %s2469_s0 = sshll.u32 %s2557_s22, 4  ;;  %s2470_s0 = int_to_ptr.vmem [resolvable:$false] %s2469_s0 }
  0xa6   : > { %2021 = vmatprep.subr.bf16.mxu1 %v2552_v0  ;;  %v691_v5 = vpack.c.bf16 %v2856_v3, %v2856_v3 }
  0xa8   : > { %2040 = vmatmul.mubr.msk.bf16.vlgmr.msra.gmra.mxu0 %vm715_vm1, %v691_v5 }
  0xa9   : > { %2022 = vmatpush3.bf16.msra.mxu1 %v2250_v2  ;;  %2051 = vmatprep.mubr.msk.bf16.mxu0 %vm2553_vm0, %v2552_v0 }
  0xaa   : > { %2027 = vmatprep.subr.bf16.mxu1 %v2552_v0 }
  0xac   : > { %2024 = vmatmul.mubr.msk.bf16.vlgmr.msra.gmra.mxu1 %vm715_vm1, %v691_v5 }
  0xad   : > { %2028 = vmatpush3.bf16.msra.mxu1 %v2251_v4  ;;  %2031 = vmatprep.mubr.msk.bf16.mxu1 %vm2553_vm0, %v2552_v0 }
  0xae   : > { %2029 = vmatprep.subr.bf16.mxu1 %v2552_v0 }
  0xb1   : > { %2030 = vmatpush3.bf16.msra.mxu1 %v2252_v6 }
  0xb2   : > { %2043 = vmatprep.subr.bf16.mxu1 %v2552_v0 }
  0xb4   : > { %2032 = vmatmul.mubr.msk.bf16.vlgmr.msra.gmra.mxu1 %vm715_vm1, %v691_v5 }
  0xb5   : > { %2045 = vmatprep.mubr.msk.bf16.mxu1 %vm2553_vm0, %v2552_v0 }
 0x168   : > { %v879_v41 = vpop.f32.mrf.mxu0 }
 0x169   : > { %v2907_v42 = vadd.f32 %v1942_v40, %v879_v41 }
 0x16a   : > { %v2041_v43 = vpop.f32.mrf.mxu0 }
 0x16b   : > { %v924_v44 = vpack.c.bf16 %v2907_v42, %v2907_v42 }
 0x16c   : > { %v753_v10 = vpop.f32.mrf.mxu1  ;;  %v882_v45 = vpop.f32.mrf.mxu0 }
 0x16d   : > { %v754_v11 = vadd.f32 %v1934_v9, %v753_v10  ;;  %v1172_v46 = vsel %vm1170_vm3, %v924_v44, 0 }
 0x16e   : > { %v2025_v12 = vpop.f32.mrf.mxu1  ;;  %v2042_v47 = vpop.f32.mrf.mxu0 }
 0x16f   : > { %v885_v13 = vmul.f32 0.35355338, %v754_v11 }
 0x170   : > { %v756_v14 = vpop.f32.mrf.mxu1 }
 0x171   : > { %887 = vrot.lane.b32.xlu1 %v885_v13, %s2554_s8  ;;  %v896_v24 = vpack.c.bf16 %v885_v13, %v885_v13 }
 0x172   : > { %v2026_v15 = vpop.f32.mrf.mxu1 }
 0x174   : > { %v816_v17 = vpop.f32.mrf.mxu1 }
 0x175   : > { %v817_v18 = vadd.f32 %v1938_v16, %v816_v17 }
 0x176   : > { %v2033_v19 = vpop.f32.mrf.mxu1 }
 0x177   : > { %907 = vrot.lane.b32.xlu1 %v817_v18, %s2555_s29  ;;  %901 = vrot.lane.b32.xlu0 %v817_v18, %s2554_s8  ;;  %v910_v20 = vpack.c.bf16 %v817_v18, %v817_v18 }
 0x178   : > { %v819_v21 = vpop.f32.mrf.mxu1 }
 0x179   : > { %v939_v22 = vsel %vm934_vm2, %v910_v20, 0 }
 0x17a   : > { %v2034_v23 = vpop.f32.mrf.mxu1  ;;  %2044 = vmatpush3.bf16.xpose.msra.mxu1 %v939_v22 }
 0x17b   : > { %893 = vrot.lane.b32.xlu1 %v885_v13, %s2555_s29  ;;  %904 = vrot.lane.b32.xlu0 %v817_v18, %s2556_s20 }
 0x17c   : > { %2055 = vmatprep.subr.bf16.mxu1 %v2552_v0 }
 0x17f   : > { %890 = vrot.lane.b32.xlu0 %v885_v13, %s2556_s20 }
 0x181   : > { %2046 = vmatmul.mubr.msk.bf16.vlgmr.msra.gmra.mxu1 %vm934_vm2, %v896_v24 }
 0x182   : > { %2057 = vmatprep.mubr.msk.bf16.mxu1 %vm2553_vm0, %v2552_v0 }
 0x1e3   : > { %v888_v25 = vpop.permute.xlu1 %887 }
 0x1e4   : > { %v897_v34 = vpack.c.bf16 %v888_v25, %v888_v25 }
 0x1e9   : > { %v902_v26 = vpop.permute.xlu0 %901  ;;  %v908_v29 = vpop.permute.xlu1 %907 }
 0x1ea   : > { %v911_v27 = vpack.c.bf16 %v902_v26, %v902_v26  ;;  %v913_v32 = vpack.c.bf16 %v908_v29, %v908_v29 }
 0x1ec   : > { %v985_v28 = vsel %vm934_vm2, %v911_v27, 0  ;;  %v1077_v36 = vsel %vm934_vm2, %v913_v32, 0 }
 0x1ed   : > { %2050 = vmatpush3.bf16.xpose.msra.mxu0 %v985_v28  ;;  %v905_v30 = vpop.permute.xlu0 %904  ;;  %v894_v38 = vpop.permute.xlu1 %893 }
 0x1ee   : > { %v912_v31 = vpack.c.bf16 %v905_v30, %v905_v30  ;;  %2061 = vmatprep.subr.bf16.mxu0 %v2552_v0  ;;  %v899_v39 = vpack.c.bf16 %v894_v38, %v894_v38 }
 0x1f0   : > { %v1031_v33 = vsel %vm934_vm2, %v912_v31, 0 }
 0x1f1   : > { %2056 = vmatpush3.bf16.xpose.msra.mxu1 %v1031_v33  ;;  %v891_v35 = vpop.permute.xlu0 %890 }
 0x1f2   : > { %2067 = vmatprep.subr.bf16.mxu1 %v2552_v0  ;;  %v898_v37 = vpack.c.bf16 %v891_v35, %v891_v35 }
 0x1f4   : > { %2052 = vmatmul.mubr.msk.bf16.vlgmr.msra.gmra.mxu0 %vm934_vm2, %v897_v34 }
 0x1f5   : > { %2062 = vmatpush3.bf16.xpose.msra.mxu0 %v1077_v36  ;;  %2063 = vmatprep.mubr.msk.bf16.mxu0 %vm2553_vm0, %v2552_v0 }
 0x1f6   : > { %2073 = vmatprep.subr.bf16.mxu0 %v2552_v0 }
 0x1f8   : > { %2058 = vmatmul.mubr.msk.bf16.vlgmr.msra.gmra.mxu1 %vm934_vm2, %v898_v37 }
 0x1f9   : > { %2069 = vmatprep.mubr.msk.bf16.mxu1 %vm2553_vm0, %v2552_v0  ;;  %2068 = vmatpush3.bf16.msra.mxu1 %v1172_v46 }
 0x1fa   : > { %2079 = vmatprep.subr.bf16.mxu1 %v2552_v0 }
 0x1fc   : > { %2064 = vmatmul.mubr.msk.bf16.vlgmr.msra.gmra.mxu0 %vm934_vm2, %v899_v39 }
 0x1fd   : > { %2075 = vmatprep.mubr.msk.bf16.mxu0 %vm2553_vm0, %v2552_v0 }
 0x241   : > { %v975_v49 = vpop.f32.mrf.mxu1 }
 0x242   : > { %v976_v50 = vadd.f32 %v1946_v48, %v975_v49 }
 0x243   : > { %v2047_v51 = vpop.f32.mrf.mxu1 }
 0x244   : > { %v1119_v52 = vsel %vm934_vm2, %v976_v50, -inf }
 0x245   : > { %1120 = vmax.xlane.f32.xlu0 %v1119_v52  ;;  %v978_v53 = vpop.f32.mrf.mxu1 }
 0x247   : > { %v2048_v54 = vpop.f32.mrf.mxu1 }
 0x2b4   : > { %v1021_v55 = vpop.f32.mrf.mxu0 }
 0x2b5   : > { %v1022_v56 = vadd.f32 %v1946_v48, %v1021_v55 }
 0x2b6   : > { %v2053_v57 = vpop.f32.mrf.mxu0 }
 0x2b7   : > { %v1122_v58 = vsel %vm934_vm2, %v1022_v56, -inf }
 0x2b8   : > { %1123 = vmax.xlane.f32.xlu1 %v1122_v58  ;;  %v1024_v59 = vpop.f32.mrf.mxu0  ;;  %v1067_v60 = vpop.f32.mrf.mxu1 }
 0x2b9   : > { %v1068_v61 = vadd.f32 %v1946_v48, %v1067_v60  ;;  %v1358_v60 = vld [vmem:[#allocation11 + $0x8] sm:$0xf] }
 0x2ba   : > { %v2054_v62 = vpop.f32.mrf.mxu0  ;;  %v2059_v63 = vpop.f32.mrf.mxu1 }
 0x2bb   : > { %v1125_v1 = vsel %vm934_vm2, %v1068_v61, -inf  ;;  %v1456_v63 = vsel %vm1170_vm3, %v1358_v60, 0 }
 0x2bc   : > { %v1113_v2 = vpop.f32.mrf.mxu0  ;;  %1126 = vmax.xlane.f32.xlu0 %v1125_v1  ;;  %v1070_v4 = vpop.f32.mrf.mxu1 }
 0x2bd   : > { %v1114_v5 = vadd.f32 %v1946_v48, %v1113_v2 }
 0x2be   : > { %v2060_v6 = vpop.f32.mrf.mxu1  ;;  %v2065_v7 = vpop.f32.mrf.mxu0 }
 0x2bf   : > { %v1128_v8 = vsel %vm934_vm2, %v1114_v5, -inf }
 0x2c0   : > { %v1116_v9 = vpop.f32.mrf.mxu0  ;;  %1129 = vmax.xlane.f32.xlu0 %v1128_v8 }
 0x2c2   : > { %v2066_v10 = vpop.f32.mrf.mxu0 }
 0x2c9   : > { %915 = vrot.lane.b32.xlu1 %v2907_v42, %s2554_s8  ;;  %s3119_s8 = sld [smem:[#allocation32_spill]] }
 0x2ce   : > { %v1121_v11 = vpop.xlane.xlu0 %1120 }
 0x2cf   : > { %v1131_v12 = vsub.f32 %v976_v50, %v1121_v11  ;;  %v1356_v50 = vld [vmem:[#allocation11] sm:$0xf] }
 0x2d0   : > { %v1364_v54 = vsel %vm1170_vm3, %v1356_v50, 0  ;;  %v2255_v50 = vld [vmem:[%s3064_s14 + $0x8] sm:$0xff]  }
 0x2d1   : > { %v1135_v13 = vmul.f32 1.442695, %v1131_v12 }
 0x2d3   : > { %2261 = vpow2.f32 %v1135_v13 }
 0x2e0   : > { %v2262_v14 = vpop.eup %2261 }
 0x2e1   : > { %v1143_v15 = vsel %vm934_vm2, %v2262_v14, 0.0 }
 0x2ed   : > { %1144 = vadd.xlane.f32.xlu1 %v1143_v15 }
 0x341   : > { %v1124_v16 = vpop.xlane.xlu1 %1123 }
 0x342   : > { %v1132_v17 = vsub.f32 %v1022_v56, %v1124_v16  ;;  %v1357_v56 = vld [vmem:[#allocation11 + $0x4] sm:$0xf] }
 0x343   : > { %v1410_v59 = vsel %vm1170_vm3, %v1357_v56, 0 }
 0x344   : > { %v1137_v18 = vmul.f32 1.442695, %v1132_v17 }
 0x345   : > { %v916_v19 = vpop.permute.xlu1 %915  ;;  %v1127_v20 = vpop.xlane.xlu0 %1126 }
 0x346   : > { %2263 = vpow2.f32 %v1137_v18  ;;  %v925_v21 = vpack.c.bf16 %v916_v19, %v916_v19  ;;  %v1133_v22 = vsub.f32 %v1068_v61, %v1127_v20 }
 0x348   : > { %v1218_v23 = vsel %vm1170_vm3, %v925_v21, 0  ;;  %v1139_v24 = vmul.f32 1.442695, %v1133_v22 }
 0x349   : > { %2074 = vmatpush3.bf16.msra.mxu0 %v1218_v23  ;;  %v1130_v25 = vpop.xlane.xlu0 %1129 }
 0x34a   : > { %2265 = vpow2.f32 %v1139_v24  ;;  %v1134_v26 = vsub.f32 %v1114_v5, %v1130_v25  ;;  %2085 = vmatprep.subr.bf16.mxu0 %v2552_v0  ;;  %v1359_v5 = vld [vmem:[#allocation11 + $0xc] sm:$0xf] }
 0x34b   : > { %v1502_v8 = vsel %vm1170_vm3, %v1359_v5, 0 }
 0x34c   : > { %v1141_v27 = vmul.f32 1.442695, %v1134_v26 }
 0x34e   : > { %2267 = vpow2.f32 %v1141_v27 }
 0x353   : > { %v2264_v28 = vpop.eup %2263 }
 0x354   : > { %v1146_v29 = vsel %vm934_vm2, %v2264_v28, 0.0 }
 0x355   : > { %1147 = vadd.xlane.f32.xlu0 %v1146_v29 }
 0x357   : > { %v2266_v30 = vpop.eup %2265 }
 0x358   : > { %v1149_v31 = vsel %vm934_vm2, %v2266_v30, 0.0 }
 0x359   : > { %1150 = vadd.xlane.f32.xlu1 %v1149_v31 }
 0x35b   : > { %v2268_v32 = vpop.eup %2267 }
 0x35c   : > { %v1152_v33 = vsel %vm934_vm2, %v2268_v32, 0.0 }
 0x35d   : > { %1153 = vadd.xlane.f32.xlu0 %v1152_v33 }
 0x36a   : > { %921 = vrot.lane.b32.xlu1 %v2907_v42, %s2555_s29  ;;  %s1975_s29 = sshll.u32 %s2674_s1, 7  ;;  %s2471_s1 = scalar_lea.vmem %s2470_s0, 256 }
 0x36b   : > { %s1777_s6 = scalar_lea.hbm %s3120_s24, %s1975_s29 }
 0x373   : > { %918 = vrot.lane.b32.xlu0 %v2907_v42, %s2556_s20  ;;  %s679_s20 = scalar_lea.vmem [#allocation14], %s1932_s26 }
 0x374   : > { %s1779_s3 = sshll.u32 %s679_s20, 4  ;;  %s1780_s3 = int_to_ptr.vmem [resolvable:$true] %s1779_s3 }
 0x375   : > { %s2465_s13 = scalar_lea.vmem %s1780_s3, 128  ;;  %p2472_p10 = scmp.lt.s32.totalorder %s1780_s3, %s2470_s0 }
 0x376   : > { %v1145_v34 = vpop.xlane.xlu1 %1144  ;;  %p2466_p2 = scmp.ne.s32.totalorder %s1780_s3, %s2465_s13  ;;  %p2473_p12 = scmp.lt.s32.totalorder %s2471_s1, %s2465_s13 }
 0x377   : > { %2269 = vrcp.f32 %v1145_v34 }
 0x378   : > { %p2467_p8 = pnand %p2466_p2, %p3121_p5  ;;  %p2474_p1 = por %p2473_p12, %p2472_p10 }
 0x37a   : > { %p2468_p7 = pneg %p2467_p8 }
 0x37c   : > { %p2475_p3 = pnand %p2474_p1, %p2468_p7 }
 0x384   : > { %v2270_v35 = vpop.eup %2269 }
 0x385   : > { %v1159_v36 = vmul.f32 %v2270_v35, %v2262_v14 }
 0x387   : > { %v1163_v37 = vpack.c.bf16 %v1159_v36, %v1159_v36  ;;  %v1959_v36 = vld [vmem:[#allocation13] ss:$0 sm:$0xff] }
 0x389   : > { %2070 = vmatmul.mubr.msk.bf16.vlgmr.msra.gmra.mxu1 %vm934_vm2, %v1163_v37 }
 0x38a   : > { %2081 = vmatprep.mubr.msk.bf16.mxu1 %vm2553_vm0, %v2552_v0 }
 0x3de   : > { %v1148_v38 = vpop.xlane.xlu0 %1147 }
 0x3df   : > { %2271 = vrcp.f32 %v1148_v38 }
 0x3e2   : > { %v1151_v39 = vpop.xlane.xlu1 %1150 }
 0x3e3   : > { %2273 = vrcp.f32 %v1151_v39 }
 0x3e6   : > { %v1154_v40 = vpop.xlane.xlu0 %1153  ;;  %v922_v41 = vpop.permute.xlu1 %921 }
 0x3e7   : > { %2275 = vrcp.f32 %v1154_v40  ;;  %v927_v45 = vpack.c.bf16 %v922_v41, %v922_v41 }
 0x3e9   : > { %v1310_v51 = vsel %vm1170_vm3, %v927_v45, 0 }
 0x3ea   : > { %v919_v43 = vpop.permute.xlu0 %918 }
 0x3eb   : > { %v926_v44 = vpack.c.bf16 %v919_v43, %v919_v43 }
 0x3ec   : > { %v2272_v42 = vpop.eup %2271 }
 0x3ed   : > { %v1264_v46 = vsel %vm1170_vm3, %v926_v44, 0  ;;  %v1160_v47 = vmul.f32 %v2272_v42, %v2264_v28 }
 0x3ee   : > { %2080 = vmatpush3.bf16.msra.mxu1 %v1264_v46 }
 0x3ef   : > { %v1164_v48 = vpack.c.bf16 %v1160_v47, %v1160_v47  ;;  %2091 = vmatprep.subr.bf16.mxu1 %v2552_v0 }
 0x3f0   : > { %v2274_v49 = vpop.eup %2273 }
 0x3f1   : > { %2076 = vmatmul.mubr.msk.bf16.vlgmr.msra.gmra.mxu0 %vm934_vm2, %v1164_v48  ;;  %v1161_v52 = vmul.f32 %v2274_v49, %v2266_v30 }
 0x3f2   : > { %2086 = vmatpush3.bf16.msra.mxu0 %v1310_v51  ;;  %2087 = vmatprep.mubr.msk.bf16.mxu0 %vm2553_vm0, %v2552_v0  ;;  %v2257_v51 = vld [vmem:[%s3066_s16 + $0x18] sm:$0xff]  }
 0x3f3   : > { %v1165_v53 = vpack.c.bf16 %v1161_v52, %v1161_v52  ;;  %2097 = vmatprep.subr.bf16.mxu0 %v2552_v0  ;;  %v2258_v52 = vld [vmem:[%s3066_s16 + $0x10] sm:$0xff]  }
 0x3f4   : > { %v2276_v55 = vpop.eup %2275 }
 0x3f5   : > { %2082 = vmatmul.mubr.msk.bf16.vlgmr.msra.gmra.mxu1 %vm934_vm2, %v1165_v53  ;;  %v1162_v57 = vmul.f32 %v2276_v55, %v2268_v32 }
 0x3f6   : > { %2092 = vmatpush3.bf16.msra.mxu1 %v1364_v54  ;;  %2093 = vmatprep.mubr.msk.bf16.mxu1 %vm2553_vm0, %v2552_v0 }
 0x3f7   : > { %v1166_v58 = vpack.c.bf16 %v1162_v57, %v1162_v57  ;;  %2103 = vmatprep.subr.bf16.mxu1 %v2552_v0  ;;  %v1960_v57 = vld [vmem:[%s3060_s10] ss:$0 sm:$0xff] }
 0x3f9   : > { %2088 = vmatmul.mubr.msk.bf16.vlgmr.msra.gmra.mxu0 %vm934_vm2, %v1166_v58 }
 0x3fa   : > { %2098 = vmatpush3.bf16.msra.mxu0 %v1410_v59  ;;  %2099 = vmatprep.mubr.msk.bf16.mxu0 %vm2553_vm0, %v2552_v0  ;;  %v1961_v59 = vld [vmem:[%s3061_s11] ss:$0 sm:$0xff] }
 0x3fb   : > { %2109 = vmatprep.subr.bf16.mxu0 %v2552_v0 }
 0x449   : > { %v1208_v61 = vpop.f32.mrf.mxu1 }
 0x44a   : > { %v1352_v62 = vpack.c.bf16 %v1208_v61, %v1208_v61 }
 0x44b   : > { %v2071_v1 = vpop.f32.mrf.mxu1 }
 0x44c   : > { %2094 = vmatmul.mubr.msk.bf16.vlgmr.msra.gmra.mxu1 %vm934_vm2, %v1352_v62  ;;  %v2260_v1 = vld [vmem:[%s3066_s16] sm:$0xff]  }
 0x44d   : > { %v1211_v2 = vpop.f32.mrf.mxu1  ;;  %2104 = vmatpush3.bf16.msra.mxu1 %v1456_v63  ;;  %2105 = vmatprep.mubr.msk.bf16.mxu1 %vm2553_vm0, %v2552_v0  ;;  %v2259_v63 = vld [vmem:[%s3066_s16 + $0x8] sm:$0xff]  }
 0x44e   : > { %2115 = vmatprep.subr.bf16.mxu1 %v2552_v0  ;;  %v1962_v2 = vld [vmem:[%s3065_s15] ss:$0 sm:$0xff] }
 0x44f   : > { %v2072_v4 = vpop.f32.mrf.mxu1 }
 0x4b1   : > { %v1254_v6 = vpop.f32.mrf.mxu0 }
 0x4b2   : > { %v1353_v7 = vpack.c.bf16 %v1254_v6, %v1254_v6 }
 0x4b3   : > { %v2077_v9 = vpop.f32.mrf.mxu0 }
 0x4b4   : > { %2100 = vmatmul.mubr.msk.bf16.vlgmr.msra.gmra.mxu0 %vm934_vm2, %v1353_v7 }
 0x4b5   : > { %v1257_v10 = vpop.f32.mrf.mxu0  ;;  %v1300_v11 = vpop.f32.mrf.mxu1  ;;  %2110 = vmatpush3.bf16.msra.mxu0 %v1502_v8  ;;  %2111 = vmatprep.mubr.msk.bf16.mxu0 %vm2553_vm0, %v2552_v0 }
 0x4b6   : > { %v1354_v12 = vpack.c.bf16 %v1300_v11, %v1300_v11  ;;  %2123 = vmatprep.subr.bf16.mxu0 %v2552_v0 }
 0x4b7   : > { %v2078_v13 = vpop.f32.mrf.mxu0  ;;  %v2083_v14 = vpop.f32.mrf.mxu1 }
 0x4b8   : > { %2106 = vmatmul.mubr.msk.bf16.vlgmr.msra.gmra.mxu1 %vm934_vm2, %v1354_v12 }
 0x4b9   : > { %v1303_v15 = vpop.f32.mrf.mxu1  ;;  %v1346_v16 = vpop.f32.mrf.mxu0  ;;  %2119 = vmatprep.mubr.msk.bf16.mxu1 %vm2553_vm0, %v2552_v0  ;;  %2116 = vmatpush3.bf16.msra.mxu1 %v2255_v50 }
 0x4ba   : > { %v1355_v17 = vpack.c.bf16 %v1346_v16, %v1346_v16  ;;  %2117 = vmatprep.subr.bf16.mxu1 %v2552_v0 }
 0x4bb   : > { %v2084_v18 = vpop.f32.mrf.mxu1  ;;  %v2089_v19 = vpop.f32.mrf.mxu0 }
 0x4bc   : > { %2112 = vmatmul.mubr.msk.bf16.vlgmr.msra.gmra.mxu0 %vm934_vm2, %v1355_v17 }
 0x4bd   : > { %v1349_v20 = vpop.f32.mrf.mxu0  ;;  %2131 = vmatprep.mubr.msk.bf16.mxu0 %vm2553_vm0, %v2552_v0  ;;  %2124 = vmatpush3.bf16.msra.mxu0 %v2257_v51 }
 0x4be   : > { %2125 = vmatprep.subr.bf16.mxu0 %v2552_v0 }
 0x4bf   : > { %v2090_v21 = vpop.f32.mrf.mxu0 }
 0x4c1   : > { %2126 = vmatpush3.bf16.msra.mxu0 %v2258_v52 }
 0x4c2   : > { %2127 = vmatprep.subr.bf16.mxu0 %v2552_v0 }
 0x4c5   : > { %2128 = vmatpush3.bf16.msra.mxu0 %v2259_v63 }
 0x4c6   : > { %2129 = vmatprep.subr.bf16.mxu0 %v2552_v0  ;;  %v1966_v0 = vld [vmem:[%s3067_s17] ss:$0 sm:$0xff] }
 0x4c9   : > { %2130 = vmatpush3.bf16.msra.mxu0 %v2260_v1 }
 0x50c   : > { %v1400_v22 = vpop.f32.mrf.mxu1 }
 0x50e   : > { %v2095_v23 = vpop.f32.mrf.mxu1 }
 0x510   : > { %v1403_v24 = vpop.f32.mrf.mxu1 }
 0x512   : > { %v2096_v25 = vpop.f32.mrf.mxu1 }
 0x574   : > { %v1446_v26 = vpop.f32.mrf.mxu0 }
 0x575   : > { %v1544_v30 = vadd.f32 %v1446_v26, %v1400_v22 }
 0x576   : > { %v2101_v27 = vpop.f32.mrf.mxu0 }
 0x577   : > { %v1972_v27 = vld [vmem:[%s3062_s12] ss:$0 sm:$0xff] }
 0x578   : > { %v1449_v28 = vpop.f32.mrf.mxu0  ;;  %v1492_v29 = vpop.f32.mrf.mxu1 }
 0x579   : > { %v1545_v33 = vadd.f32 %v1544_v30, %v1492_v29  ;;  %v1973_v29 = vld [vmem:[%s3119_s8] ss:$0 sm:$0xff] }
 0x57a   : > { %v2102_v31 = vpop.f32.mrf.mxu0  ;;  %v2107_v32 = vpop.f32.mrf.mxu1 }
 0x57c   : > { %v1495_v34 = vpop.f32.mrf.mxu1  ;;  %v1538_v35 = vpop.f32.mrf.mxu0 }
 0x57d   : > { %v1546_v37 = vadd.f32 %v1545_v33, %v1538_v35 }
 0x57e   : > { %v2108_v38 = vpop.f32.mrf.mxu1  ;;  %v2113_v39 = vpop.f32.mrf.mxu0 }
 0x57f   : > { %v1554_v40 = vadd.f32 %v1959_v36, %v1546_v37 }
 0x580   : > { %v1541_v41 = vpop.f32.mrf.mxu0 }
 0x581   : > { %v1555_v43 = vadd.f32 %v1554_v40, %v2856_v3  ;;  %v2256_v3 = vld [vmem:[%s3064_s14] sm:$0xff]  }
 0x582   : > { %v2114_v44 = vpop.f32.mrf.mxu0  ;;  %2118 = vmatpush3.bf16.msra.mxu1 %v2256_v3 }
 0x583   : > { %v1556_v42 = vsel %vm715_vm1, %v1555_v43, 0.0 }
 0x584   : > { %1557 = vadd.xlane.f32.xlu1 %v1556_v42 }
 0x60d   : > { %v1558_v45 = vpop.xlane.xlu1 %1557 }
 0x60e   : > { %v1560_v46 = vmul.f32 0.03125, %v1558_v45 }
 0x610   : > { %v1561_v47 = vsub.f32 %v1555_v43, %v1560_v46 }
 0x612   : > { %v1562_v48 = vmul.f32 %v1561_v47, %v1561_v47 }
 0x614   : > { %v1563_v49 = vsel %vm715_vm1, %v1562_v48, 0.0 }
 0x615   : > { %1564 = vadd.xlane.f32.xlu0 %v1563_v49 }
 0x69e   : > { %v1565_v53 = vpop.xlane.xlu0 %1564 }
 0x69f   : > { %v1566_v54 = vmul.f32 0.03125, %v1565_v53 }
 0x6a1   : > { %v1567_v55 = vadd.f32 1e-05, %v1566_v54 }
 0x6a3   : > { %2277 = vrsqrt.f32 %v1567_v55 }
 0x6b0   : > { %v2278_v56 = vpop.eup %2277 }
 0x6b1   : > { %v1569_v58 = vmul.f32 %v2278_v56, %v1561_v47 }
 0x6b3   : > { %v1576_v60 = vmul.f32 %v1960_v57, %v1569_v58 }
 0x6b5   : > { %v1583_v61 = vadd.f32 %v1961_v59, %v1576_v60 }
 0x6b7   : > { %v1584_v62 = vpack.c.bf16 %v1583_v61, %v1583_v61 }
 0x6b9   : > { %2120 = vmatmul.mubr.msk.bf16.vlgmr.msra.gmra.mxu1 %vm715_vm1, %v1584_v62 }
 0x779   : > { %v1645_v4 = vpop.f32.mrf.mxu1 }
 0x77a   : > { %v1646_v5 = vadd.f32 %v1962_v2, %v1645_v4 }
 0x77b   : > { %v2121_v6 = vpop.f32.mrf.mxu1 }
 0x77c   : > { %v1651_v7 = vmax.f32 %v1646_v5, 0.0 }
 0x77d   : > { %v1648_v8 = vpop.f32.mrf.mxu1 }
 0x77e   : > { %v1652_v9 = vpack.c.bf16 %v1651_v7, %v1651_v7 }
 0x77f   : > { %v2122_v10 = vpop.f32.mrf.mxu1 }
 0x780   : > { %2132 = vmatmul.mubr.msk.bf16.vlgmr.msra.gmra.mxu0 %vm1692_vm4, %v1652_v9 }
 0x840   : > { %v1730_v11 = vpop.f32.mrf.mxu0 }
 0x841   : > { %v1731_v12 = vadd.f32 %v1966_v0, %v1730_v11 }
 0x842   : > { %v2133_v13 = vpop.f32.mrf.mxu0 }
 0x843   : > { %v1736_v14 = vadd.f32 %v1731_v12, %v1583_v61 }
 0x844   : > { %v1733_v15 = vpop.f32.mrf.mxu0 }
 0x845   : > { %v1737_v16 = vsel %vm715_vm1, %v1736_v14, 0.0 }
 0x846   : > { %1738 = vadd.xlane.f32.xlu0 %v1737_v16  ;;  %v2134_v17 = vpop.f32.mrf.mxu0 }
 0x8cf   : > { %v1739_v18 = vpop.xlane.xlu0 %1738 }
 0x8d0   : > { %v1740_v19 = vmul.f32 0.03125, %v1739_v18 }
 0x8d2   : > { %v1741_v20 = vsub.f32 %v1736_v14, %v1740_v19 }
 0x8d4   : > { %v1742_v21 = vmul.f32 %v1741_v20, %v1741_v20 }
 0x8d6   : > { %v1743_v22 = vsel %vm715_vm1, %v1742_v21, 0.0 }
 0x8d7   : > { %1744 = vadd.xlane.f32.xlu1 %v1743_v22 }
 0x960   : > { %v1745_v23 = vpop.xlane.xlu1 %1744 }
 0x961   : > { %v1746_v24 = vmul.f32 0.03125, %v1745_v23 }
 0x963   : > { %v1747_v25 = vadd.f32 1e-05, %v1746_v24 }
 0x965   : > { %2279 = vrsqrt.f32 %v1747_v25 }
 0x972   : > { %v2280_v26 = vpop.eup %2279 }
 0x973   : > { %v1749_v28 = vmul.f32 %v2280_v26, %v1741_v20 }
 0x975   : > { %v1756_v30 = vmul.f32 %v1972_v27, %v1749_v28 }
 0x977   : > { %v1763_v31 = vadd.f32 %v1973_v29, %v1756_v30 }
 0x979   : > { %1764 = vst.msk [vmem:[%s679_s20] sm:$0xff] %vm715_vm1, %v1763_v31 }
 0x97a   : > { %2478 = shalt.err (!%p2475_p3)
}
 0x97b   : > { %s2479_s26 = scalar_lea.hbm %s1777_s6, 128  ;;  %s2483_s8 = scalar_lea.hbm %s3120_s24, 256 }
 0x97c   : > { %p2480_p6 = scmp.ne.s32.totalorder %s1777_s6, %s2479_s26  ;;  %p2484_p11 = scmp.lt.s32.totalorder %s1777_s6, %s3120_s24 }
 0x97d   : > { %p2485_p13 = scmp.lt.s32.totalorder %s2483_s8, %s2479_s26 }
 0x97e   : > { %p2481_p4 = pnand %p2480_p6, %p3121_p5 }
 0x97f   : > { %p2486_p0 = por %p2485_p13, %p2484_p11 }
 0x980   : > { %p2482_p9 = pneg %p2481_p4 }
 0x982   : > { %p2487_p2 = pnand %p2486_p0, %p2482_p9 }
 0x984   : > { %2490 = shalt.err (!%p2487_p2)
}
 0x985   : > { %2161 = dma.vmem_to_hbm [thread:$0]  (%p3121_p5), %s1780_s3, 128, %s1777_s6, %s1766_s25  }
 0x986 PF: > { %s1791_s2 = sand.u32 1, %s2529_s27   ;;  %p3122_p8 = scmp.ne.s32.totalorder %s3106_s21, 0 }
 0x987   : > { %p3123_p7 = scmp.ge.s32.totalorder %s2541_s30, 2  ;;  %s1792_s18 = scalar_lea.sflag [#allocation4], %s1791_s2 }
 0x989   : > { %p2187_p10 = pnand %p3123_p7, %p3122_p8 }
 0x98b   : > { %p2188_p12 = pneg %p2187_p10 }
 0x98d   : > { %2524 = dma.done.wait (%p2188_p12), %s1792_s18, 128  }
 0x98e   : > { %2526 = vsyncadd (%p2188_p12), %s1792_s18, 4294967168  ;;  %s3124_s30 = sld [smem:[#allocation21_spill]]  ;;  %s3127_s27 = smov %s2533_s28 }
 0x98f   : > { %s3125_s13 = sld [smem:[#allocation20_spill]] }
 0x990   : > { %s3126_s29 = sld [smem:[#allocation22_spill]] }
 0x994   : > { %p34_p1 = scmp.ge.s32.totalorder %s3124_s30, 4  }
 0x995   : > { %s3128_s28 = smov %s3125_s13 }
 0x996   :  { %36 = sbr.rel (!%p34_p1) target bundleno = 20 (0x14), region = 164 }
 0x99b   :  { %1797 = vsyncpa [#allocation3], 1 }
 0x99c   :  { %1799 = vsyncpa [#allocation3 + $0x1], 1 }
 0x99d   :  { %1800 = vsyncpa [#allocation6], 1 }
 0x99e   :  { %1801 = vsyncpa [#allocation9], 1 }
 0x99f   :  { %1802 = vsyncpa [#allocation12], 1 }
 0x9a0   :  { %1803 = vsyncpa [#allocation4], 1 }
 0x9a1   :  { %1805 = vsyncpa [#allocation4 + $0x1], 1 }

// kernel: tpu_custom_call.1
= control target key start
LH: loop header
LB: loop body
LE: loop exit
PB: predicated region body
PF: predicated region fallthrough
CT: control target
= control target key end

     0   :  { %s3050_s0 = inlined_call_operand.vmem [shape: f32[2,8,32], index: 0, kind: input, shape index: {}]   ;;  %s3051_s1 = inlined_call_operand.hbm [shape: f32[2,1,8], index: 1, kind: input, shape index: {}]   ;;  %s3052_s2 = inlined_call_operand.vmem [shape: bf16[32,32], index: 2, kind: input, shape index: {}]   ;;  %s3053_s3 = inlined_call_operand.hbm [shape: f32[1,32], index: 3, kind: input, shape index: {}]   ;;  %s3054_s4 = inlined_call_operand.vmem [shape: bf16[32,32], index: 4, kind: input, shape index: {}]   ;;  %s3055_s5 = inlined_call_operand.hbm [shape: f32[1,32], index: 5, kind: input, shape index: {}]   ;;  %s3056_s6 = inlined_call_operand.hbm [shape: bf16[32,32], index: 6, kind: input, shape index: {}]   ;;  %s3057_s7 = inlined_call_operand.hbm [shape: f32[1,32], index: 7, kind: input, shape index: {}]   ;;  %s3058_s8 = inlined_call_operand.hbm [shape: bf16[4,8,32], index: 8, kind: input, shape index: {}]   ;;  %s3059_s9 = inlined_call_operand.hbm [shape: f32[1,32], index: 9, kind: input, shape index: {}]   ;;  %s3060_s10 = inlined_call_operand.vmem [shape: f32[1,32], index: 10, kind: input, shape index: {}]   ;;  %s3061_s11 = inlined_call_operand.vmem [shape: f32[1,32], index: 11, kind: input, shape index: {}]   ;;  %s3062_s12 = inlined_call_operand.vmem [shape: f32[1,32], index: 12, kind: input, shape index: {}]   ;;  %s3063_s13 = inlined_call_operand.vmem [shape: f32[1,32], index: 13, kind: input, shape index: {}]   ;;  %s3064_s14 = inlined_call_operand.vmem [shape: bf16[32,64], index: 14, kind: input, shape index: {}]   ;;  %s3065_s15 = inlined_call_operand.vmem [shape: f32[1,64], index: 15, kind: input, shape index: {}]   ;;  %s3066_s16 = inlined_call_operand.vmem [shape: bf16[64,32], index: 16, kind: input, shape index: {}]   ;;  %s3067_s17 = inlined_call_operand.vmem [shape: f32[1,32], index: 17, kind: input, shape index: {}]   ;;  %s3068_s18 = inlined_call_operand.hbm [shape: f32[2,8,32], index: 18, kind: output, shape index: {}]  }
   0x1   :  { %3079 = sst [smem:[#allocation23_spill]] %s3050_s0 }
   0x2   :  { %3080 = sst [smem:[#allocation24_spill]] %s3051_s1 }
   0x3   :  { %3081 = sst [smem:[#allocation25_spill]] %s3052_s2 }
   0x4   :  { %3082 = sst [smem:[#allocation26_spill]] %s3053_s3 }
   0x5   :  { %3083 = sst [smem:[#allocation27_spill]] %s3055_s5 }
   0x6   :  { %3084 = sst [smem:[#allocation28_spill]] %s3056_s6 }
   0x7   :  { %3085 = sst [smem:[#allocation29_spill]] %s3057_s7 }
   0x8   :  { %3086 = sst [smem:[#allocation30_spill]] %s3058_s8 }
   0x9   :  { %3087 = sst [smem:[#allocation31_spill]] %s3059_s9 }
   0xa   :  { %3088 = sst [smem:[#allocation32_spill]] %s3063_s13 }
   0xb   :  { %3089 = sst [smem:[#allocation33_spill]] %s3068_s18 }
   0xc   :  { %23 = vsyncpa [#allocation3], 0 }
   0xd   :  { %25 = vsyncpa [#allocation3 + $0x1], 0 }
   0xe   :  { %26 = vsyncpa [#allocation6], 0 }
   0xf   :  { %27 = vsyncpa [#allocation9], 0 }
  0x10   :  { %28 = vsyncpa [#allocation12], 0 }
  0x11   :  { %29 = vsyncpa [#allocation4], 0 }
  0x12   :  { %31 = vsyncpa [#allocation4 + $0x1], 0  ;;  %s2653_s27 = smov 0   ;;  %s2655_s28 = smov 0  }
  0x13   :  { %s2657_s29 = smov 0   ;;  %s2659_s30 = smov 0  }
  0x14 LB: > { %3090 = sst [smem:[#allocation20_spill]] %s2537_s29  ;;  %s2543_s0 = smov [#allocation5]   ;;  %s2541_s30 = sphi %s2659_s30, %s3124_s30   ;;  %s2537_s29 = sphi %s2657_s29, %s3126_s29   ;;  %s2533_s28 = sphi %s2655_s28, %s3128_s28   ;;  %s2529_s27 = sphi %s2653_s27, %s3127_s27  }
  0x15   : > { %s472_s19 = sshll.u32 %s2543_s0, 4  ;;  %s2674_s1 = sadd.s32 4294967295, %s2541_s30   ;;  %s473_s19 = int_to_ptr.vmem [resolvable:$true] %s472_s19 }
  0x16   : > { %p1916_p0 = scmp.ge.s32.totalorder %s2541_s30, 1  ;;  %p3072_p1 = scmp.eq.s32.totalorder %s2674_s1, 0 }
  0x17   : > { %p456_p2 = scmp.lt.s32.totalorder %s2541_s30, 3  ;;  %s2544_s21 = smov [#allocation8]  }
  0x18   : > { %s496_s22 = sshll.u32 %s2544_s21, 4  ;;  %s2545_s23 = smov [#allocation11]   ;;  %s2686_s22 = int_to_ptr.vmem [resolvable:$true] %s496_s22 }
  0x19   : > { %p2679_p3 = pnand %p1916_p0, %p456_p2  ;;  %s520_s24 = sshll.u32 %s2545_s23, 4  ;;  %s2694_s24 = int_to_ptr.vmem [resolvable:$true] %s520_s24 }
  0x1a   : > { %s2292_s26 = scalar_lea.vmem %s473_s19, 16  ;;  %s2299_s0 = scalar_lea.vmem %s473_s19, 32 }
  0x1b   : > { %s3091_s20 = scalar_select %p2679_p3, 1, 0 }
  0x1c   : > { %p2163_p5 = pneg %p2679_p3  ;;  %p2293_p8 = scmp.ne.s32.totalorder %s473_s19, %s2292_s26 }
  0x1d   : > { %p2300_p11 = scmp.lt.s32.totalorder %s473_s19, %s473_s19  ;;  %p2301_p12 = scmp.lt.s32.totalorder %s2299_s0, %s2292_s26 }
  0x1e   : > { %p2690_p6 = pnand %p2163_p5, %p3072_p1 }
  0x1f   : > { %p2302_p13 = por %p2301_p12, %p2300_p11 }
  0x20   : > { %p2698_p7 = pneg %p2690_p6 }
  0x22   : > { %p2295_p9 = pnand %p2293_p8, %p2698_p7 }
  0x24   : > { %p2296_p10 = pneg %p2295_p9 }
  0x26   : > { %p2303_p0 = pnand %p2302_p13, %p2296_p10 }
  0x28   : > { %2306 = shalt.err (!%p2303_p0)
}
  0x29   : > { %s3094_s3 = sld [smem:[#allocation26_spill]]  ;;  %s2318_s18 = scalar_lea.vmem %s2686_s22, 256 }
  0x2a   : > { %p2319_p2 = scmp.ne.s32.totalorder %s2686_s22, %s2318_s18  ;;  %p2326_p9 = scmp.lt.s32.totalorder %s2686_s22, %s2686_s22 }
  0x2b   : > { %p2327_p11 = scmp.lt.s32.totalorder %s2318_s18, %s2318_s18 }
  0x2c   : > { %p2321_p5 = pnand %p2319_p2, %p2698_p7 }
  0x2d   : > { %p2328_p10 = por %p2327_p11, %p2326_p9 }
  0x2e   : > { %p2322_p8 = pneg %p2321_p5 }
  0x2f   : > { %2166 = dma.hbm_to_vmem [thread:$0]  (!%p2690_p6), %s3094_s3, 16, %s473_s19, [#allocation6]  }
  0x30   : > { %p2329_p12 = pnand %p2328_p10, %p2322_p8 }
  0x32   : > { %2332 = shalt.err (!%p2329_p12)
}
  0x33   : > { %s2546_s26 = smov 64   ;;  %s2547_s0 = smov 4  }
  0x34   : > { %s3095_s6 = sld [smem:[#allocation28_spill]]  ;;  %s2344_s23 = scalar_lea.vmem %s2694_s24, 256 }
  0x35   : > { %p2345_p13 = scmp.ne.s32.totalorder %s2694_s24, %s2344_s23  ;;  %p2352_p5 = scmp.lt.s32.totalorder %s2694_s24, %s2694_s24 }
  0x36   : > { %p2353_p8 = scmp.lt.s32.totalorder %s2344_s23, %s2344_s23 }
  0x37   : > { %p2347_p0 = pnand %p2345_p13, %p2698_p7 }
  0x38   : > { %p2354_p9 = por %p2353_p8, %p2352_p5 }
  0x39   : > { %p2348_p2 = pneg %p2347_p0 }
  0x3a   : > { %2172 = dma.hbm_to_vmem [thread:$0]  (!%p2690_p6), %s3095_s6, 256, %s2686_s22, [#allocation9], %s2546_s26, %s2546_s26, %s2547_s0  }
  0x3b   : > { %p2355_p11 = pnand %p2354_p9, %p2348_p2 }
  0x3d   : > { %2358 = shalt.err (!%p2355_p11)
}
  0x3e   : > { %s3096_s8 = sld [smem:[#allocation30_spill]]  ;;  %s2548_s22 = smov [#allocation7]  }
  0x3f   : > { %s486_s19 = sshll.u32 %s2548_s22, 4  ;;  %s2549_s21 = smov [#allocation10]   ;;  %s487_s19 = int_to_ptr.vmem [resolvable:$true] %s486_s19 }
  0x40   : > { %s510_s6 = sshll.u32 %s2549_s21, 4  ;;  %s2370_s13 = scalar_lea.vmem %s487_s19, 16  ;;  %s511_s6 = int_to_ptr.vmem [resolvable:$true] %s510_s6 }
  0x41   : > { %p2371_p10 = scmp.ne.s32.totalorder %s487_s19, %s2370_s13  ;;  %s2377_s23 = scalar_lea.vmem %s487_s19, 32 }
  0x42   : > { %p2378_p0 = scmp.lt.s32.totalorder %s487_s19, %s487_s19  ;;  %p2379_p2 = scmp.lt.s32.totalorder %s2377_s23, %s2370_s13 }
  0x43   : > { %p2373_p12 = pnand %p2371_p10, %p2698_p7 }
  0x44   : > { %2178 = dma.hbm_to_vmem [thread:$0]  (!%p2690_p6), %s3096_s8, 256, %s2694_s24, [#allocation12], %s2546_s26, %s2546_s26, %s2547_s0  }
  0x45   : > { %p2374_p13 = pneg %p2373_p12  ;;  %p2380_p5 = por %p2379_p2, %p2378_p0 }
  0x47   : > { %p2381_p8 = pnand %p2380_p5, %p2374_p13 }
  0x49   : > { %2384 = shalt.err (!%p2381_p8)
}
  0x4a   : > { %s3097_s5 = sld [smem:[#allocation27_spill]]  ;;  %s2396_s26 = scalar_lea.vmem %s511_s6, 16 }
  0x4b   : > { %p2397_p9 = scmp.ne.s32.totalorder %s511_s6, %s2396_s26  ;;  %s2403_s0 = scalar_lea.vmem %s511_s6, 32 }
  0x4c   : > { %p2404_p12 = scmp.lt.s32.totalorder %s511_s6, %s511_s6  ;;  %p2405_p4 = scmp.lt.s32.totalorder %s2403_s0, %s2396_s26 }
  0x4d   : > { %p2399_p11 = pnand %p2397_p9, %p2698_p7 }
  0x4e   : > { %p2406_p1 = por %p2405_p4, %p2404_p12 }
  0x4f   : > { %p2400_p10 = pneg %p2399_p11 }
  0x50   : > { %2169 = dma.hbm_to_vmem [thread:$0]  (!%p2690_p6), %s3097_s5, 16, %s487_s19, [#allocation6]  }
  0x51   : > { %p2407_p0 = pnand %p2406_p1, %p2400_p10 }
  0x53   : > { %2410 = shalt.err (!%p2407_p0)
}
  0x54   : > { %s3098_s7 = sld [smem:[#allocation29_spill]]  ;;  %s2550_s22 = smov [#allocation13]  }
  0x55   : > { %s534_s19 = sshll.u32 %s2550_s22, 4  ;;  %s535_s19 = int_to_ptr.vmem [resolvable:$true] %s534_s19 }
  0x56   : > { %s2422_s21 = scalar_lea.vmem %s535_s19, 16  ;;  %s2429_s23 = scalar_lea.vmem %s535_s19, 32 }
  0x57   : > { %p2423_p13 = scmp.ne.s32.totalorder %s535_s19, %s2422_s21  ;;  %p2430_p8 = scmp.lt.s32.totalorder %s535_s19, %s535_s19 }
  0x58   : > { %p2431_p4 = scmp.lt.s32.totalorder %s2429_s23, %s2422_s21 }
  0x59   : > { %p2425_p2 = pnand %p2423_p13, %p2698_p7 }
  0x5a   : > { %2175 = dma.hbm_to_vmem [thread:$0]  (!%p2690_p6), %s3098_s7, 16, %s511_s6, [#allocation9]  }
  0x5b   : > { %p2426_p5 = pneg %p2425_p2  ;;  %p2432_p1 = por %p2431_p4, %p2430_p8 }
  0x5d   : > { %p2433_p9 = pnand %p2432_p1, %p2426_p5 }
  0x5f   : > { %2436 = shalt.err (!%p2433_p9)
}
  0x60   : > { %s3099_s9 = sld [smem:[#allocation31_spill]]  ;;  %s1915_s6 = sadd.s32 4294967294, %s2541_s30  }
  0x61   : > { %s2756_s2 = sadd.s32 1, %s2541_s30   ;;  %s70_s26 = sadd.s32 1, %s2537_s29 }
  0x62   : > { %3100 = sst [smem:[#allocation21_spill]] %s2756_s2  ;;  %s67_s25 = ssub.s32 %s2541_s30, %s2756_s2 }
  0x63   : > { %p68_p7 = scmp.eq.s32.totalorder %s67_s25, 0  ;;  %p77_p11 = scmp.ne.s32.totalorder %s2537_s29, %s2533_s28 }
  0x64   : > { %p78_p10 = scmp.eq.s32.totalorder %s2541_s30, 0  ;;  %p83_p12 = scmp.ne.s32.totalorder %s2533_s28, %s2529_s27 }
  0x65   : > { %s2767_s0 = scalar_select %p68_p7, %s2537_s29, %s70_s26  }
  0x66   : > { %2181 = dma.hbm_to_vmem [thread:$0]  (!%p2690_p6), %s3099_s9, 16, %s535_s19, [#allocation12]  }
  0x67   : > { %3101 = sst [smem:[#allocation22_spill]] %s2767_s0  ;;  %p2769_p0 = por %p78_p10, %p77_p11 }
  0x68   : > { %p3103_p13 = scmp.eq.s32.totalorder %s2674_s1, 0  ;;  %p443_p2 = scmp.eq.s32.totalorder %s2674_s1, 1 }
  0x69   : > { %p449_p5 = scmp.eq.s32.totalorder %s1915_s6, 1  ;;  %p2196_p8 = scmp.lt.s32.totalorder %s2541_s30, 2 }
  0x6a   : > { %p2775_p6 = por %p3103_p13, %p83_p12  ;;  %s576_s22 = sand.u32 1, %s2537_s29  }
  0x6b   : > { %p2782_p4 = por %p443_p2, %p77_p11  ;;  %p2786_p1 = por %p449_p5, %p83_p12 }
  0x6c   : > { %s3104_s18 = scalar_select %p2775_p6, 1, 0 }
  0x6d   : > { %s3105_s19 = scalar_select %p2782_p4, 1, 0 }
  0x6e   : > { %s3106_s21 = scalar_select %p2786_p1, 1, 0 }
  0x6f   : > { %s1924_s23 = sshll.u32 %s2541_s30, 4  ;;  %s579_s3 = scalar_lea.vmem [#allocation2], %s576_s22 }
  0x70   : > { %s586_s24 = sshll.u32 %s579_s3, 4  ;;  %s3107_s5 = sld [smem:[#allocation24_spill]]  ;;  %s587_s24 = int_to_ptr.vmem [resolvable:$true] %s586_s24 }
  0x71   : > { %p2798_p9 = pnand %p2196_p8, %p2769_p0  ;;  %s577_s8 = scalar_lea.sflag [#allocation3], %s576_s22 }
  0x73   : > { %p2439_p11 = pneg %p2798_p9 }
  0x76   : > { %s2794_s7 = scalar_lea.hbm %s3107_s5, %s1924_s23  ;;  %s2442_s25 = scalar_lea.hbm %s3107_s5, 32 }
  0x77   : > { %s2437_s9 = scalar_lea.hbm %s2794_s7, 16  ;;  %p2443_p13 = scmp.lt.s32.totalorder %s2794_s7, %s3107_s5 }
  0x78   : > { %p2438_p7 = scmp.ne.s32.totalorder %s2794_s7, %s2437_s9  ;;  %p2444_p0 = scmp.lt.s32.totalorder %s2442_s25, %s2437_s9 }
  0x7a   : > { %p2440_p10 = pnand %p2439_p11, %p2438_p7  ;;  %p2445_p2 = por %p2444_p0, %p2443_p13 }
  0x7c   : > { %p2441_p12 = pneg %p2440_p10 }
  0x7e   : > { %p2446_p5 = pnand %p2445_p2, %p2441_p12 }
  0x80   : > { %2449 = shalt.err (!%p2446_p5)
}
  0x81   : > { %s2450_s13 = scalar_lea.vmem %s587_s24, 16  ;;  %s2551_s22 = smov [#allocation2]  }
  0x82   : > { %p2451_p8 = scmp.ne.s32.totalorder %s587_s24, %s2450_s13  ;;  %s2455_s29 = sshll.u32 %s2551_s22, 4  ;;  %s2456_s29 = int_to_ptr.vmem [resolvable:$false] %s2455_s29 }
  0x83   : > { %s2457_s2 = scalar_lea.vmem %s2456_s29, 32  ;;  %p2458_p7 = scmp.lt.s32.totalorder %s587_s24, %s2456_s29 }
  0x84   : > { %p2453_p1 = pnand %p2451_p8, %p2439_p11  ;;  %p2459_p10 = scmp.lt.s32.totalorder %s2457_s2, %s2450_s13 }
  0x86   : > { %p2454_p4 = pneg %p2453_p1  ;;  %p2460_p6 = por %p2459_p10, %p2458_p7 }
  0x88   : > { %p2461_p3 = pnand %p2460_p6, %p2454_p4 }
  0x8a   : > { %2464 = shalt.err (!%p2461_p3)
}
  0x8b   : > { %2185 = dma.hbm_to_vmem [thread:$0]  (!%p2798_p9), %s2794_s7, 16, %s587_s24, %s577_s8  }
  0x8c   : > { %p3109_p12 = scmp.ne.s32.totalorder %s3091_s20, 0 }
  0x8d   : > { %s2819_s9 = sand.u32 (!%p3109_p12), 1, %s2533_s28   ;;  %p3110_p1 = scmp.ne.s32.totalorder (!%p3109_p12), %s3104_s18, 0 }
  0x8e   : > { %595 = sbr.rel (%p3109_p12) target bundleno = 2438 (0x986), region = 92  ;;  %s598_s0 = scalar_lea.sflag (!%p3109_p12), [#allocation3], %s2819_s9 }
  0x8f   : > { %s600_s3 = scalar_lea.vmem (!%p3109_p12), [#allocation2], %s2819_s9 }
  0x93   : > { %2508 = dma.done.wait (%p3110_p1), %s598_s0, 16  }
  0x94   : > { %2510 = vsyncadd (%p3110_p1), %s598_s0, 4294967280  ;;  %p3111_p3 = scmp.eq.s32.totalorder %s2674_s1, 0 }
  0x96   : > { %2512 = dma.done.wait (%p3111_p3), [#allocation6], 32   ;;  %p3112_p6 = pmov %p3111_p3 }
  0x97   : > { %p3113_p4 = pmov %p3111_p3 }
  0x98   : > { %2514 = vsyncadd (%p3112_p6), [#allocation6], 4294967264 }
  0x99   : > { %2516 = dma.done.wait (%p3113_p4), [#allocation9], 272   ;;  %p3114_p9 = pmov %p3111_p3 }
  0x9a   : > { %p3115_p11 = pmov %p3111_p3 }
  0x9b   : > { %2518 = vsyncadd (%p3114_p9), [#allocation9], 4294967024 }
  0x9c   : > { %2520 = dma.done.wait (%p3115_p11), [#allocation12], 272   ;;  %p3116_p13 = pmov %p3111_p3 }
  0x9d   : > { %p680_p0 = scmp.lt.s32.totalorder %s2674_s1, 1  ;;  %v2552_v0 = vmov 0.0   ;;  %vm2553_vm0 = vmmov 0   ;;  %s3117_s2 = sld [smem:[#allocation23_spill]]  ;;  %vm715_vm1 = vcmask 261120   ;;  %v2251_v4 = vld [vmem:[%s3054_s4 + $0x8] sm:$0xff]  }
  0x9e   : > { %2522 = vsyncadd (%p3116_p13), [#allocation12], 4294967024  ;;  %2019 = vmatprep.subr.bf16.mxu1 %v2552_v0  ;;  %2023 = vmatprep.mubr.msk.bf16.mxu1 %vm2553_vm0, %v2552_v0  ;;  %s3118_s23 = sld [smem:[#allocation25_spill]]  ;;  %v2252_v6 = vld [vmem:[%s3054_s4] sm:$0xff]   ;;  %v2253_v7 = vld [vmem:[#allocation8 + $0x8] sm:$0xff]   ;;  %vm934_vm2 = vcmask 64512  }
  0x9f   : > { %s681_s7 = scalar_select %p680_p0, %s2674_s1, 1  ;;  %2035 = vmatprep.subr.bf16.mxu0 %v2552_v0  ;;  %2039 = vmatprep.mubr.msk.bf16.mxu0 %vm2553_vm0, %v2552_v0  ;;  %v2254_v8 = vld [vmem:[#allocation8] sm:$0xff]   ;;  %v1934_v9 = vld [vmem:[#allocation5] ss:$0 sm:$0xff]  ;;  %v1938_v16 = vld [vmem:[#allocation7] ss:$0 sm:$0xff] }
  0xa0   : > { %2036 = vmatpush3.bf16.msra.mxu0 %v2253_v7  ;;  %s2555_s29 = smov 104   ;;  %s2556_s20 = smov 112   ;;  %v1942_v40 = vld [vmem:[#allocation10] ss:$0 sm:$0xff]  ;;  %vm1170_vm3 = vcmask 1043456   ;;  %vm1692_vm4 = vcmask 523264  }
  0xa1   : > { %s1933_s8 = sshll.u32 %s681_s7, 3  ;;  %2037 = vmatprep.subr.bf16.mxu0 %v2552_v0  ;;  %v1946_v48 = vld [vmem:[%s600_s3] ss:$0 sm:$0xff]  ;;  %s1932_s26 = sshll.u32 %s2819_s9, 3 }
  0xa2   : > { %s3120_s24 = sld [smem:[#allocation33_spill]]  ;;  %s1766_s25 = scalar_lea.sflag [#allocation4], %s2819_s9 }
  0xa3   : > { %s683_s18 = scalar_lea.vmem %s3117_s2, %s1933_s8  ;;  %s2554_s8 = smov 120  }
  0xa4   : > { %v2249_v1 = vld [vmem:[%s3118_s23 + $0x8] sm:$0xff]   ;;  %v2250_v2 = vld [vmem:[%s3118_s23] sm:$0xff]   ;;  %2038 = vmatpush3.bf16.msra.mxu0 %v2254_v8  ;;  %p3121_p5 = scmp.ne.s32.totalorder %s3105_s19, 0  ;;  %s2557_s22 = smov [#allocation14]  }
  0xa5   : > { %2020 = vmatpush3.bf16.msra.mxu1 %v2249_v1  ;;  %v2856_v3 = vld [vmem:[%s683_s18] sm:$0xff]  ;;  %2049 = vmatprep.subr.bf16.mxu0 %v2552_v0  ;;  %s2469_s0 = sshll.u32 %s2557_s22, 4  ;;  %s2470_s0 = int_to_ptr.vmem [resolvable:$false] %s2469_s0 }
  0xa6   : > { %2021 = vmatprep.subr.bf16.mxu1 %v2552_v0  ;;  %v691_v5 = vpack.c.bf16 %v2856_v3, %v2856_v3 }
  0xa8   : > { %2040 = vmatmul.mubr.msk.bf16.vlgmr.msra.gmra.mxu0 %vm715_vm1, %v691_v5 }
  0xa9   : > { %2022 = vmatpush3.bf16.msra.mxu1 %v2250_v2  ;;  %2051 = vmatprep.mubr.msk.bf16.mxu0 %vm2553_vm0, %v2552_v0 }
  0xaa   : > { %2027 = vmatprep.subr.bf16.mxu1 %v2552_v0 }
  0xac   : > { %2024 = vmatmul.mubr.msk.bf16.vlgmr.msra.gmra.mxu1 %vm715_vm1, %v691_v5 }
  0xad   : > { %2028 = vmatpush3.bf16.msra.mxu1 %v2251_v4  ;;  %2031 = vmatprep.mubr.msk.bf16.mxu1 %vm2553_vm0, %v2552_v0 }
  0xae   : > { %2029 = vmatprep.subr.bf16.mxu1 %v2552_v0 }
  0xb1   : > { %2030 = vmatpush3.bf16.msra.mxu1 %v2252_v6 }
  0xb2   : > { %2043 = vmatprep.subr.bf16.mxu1 %v2552_v0 }
  0xb4   : > { %2032 = vmatmul.mubr.msk.bf16.vlgmr.msra.gmra.mxu1 %vm715_vm1, %v691_v5 }
  0xb5   : > { %2045 = vmatprep.mubr.msk.bf16.mxu1 %vm2553_vm0, %v2552_v0 }
 0x168   : > { %v879_v41 = vpop.f32.mrf.mxu0 }
 0x169   : > { %v2907_v42 = vadd.f32 %v1942_v40, %v879_v41 }
 0x16a   : > { %v2041_v43 = vpop.f32.mrf.mxu0 }
 0x16b   : > { %v924_v44 = vpack.c.bf16 %v2907_v42, %v2907_v42 }
 0x16c   : > { %v753_v10 = vpop.f32.mrf.mxu1  ;;  %v882_v45 = vpop.f32.mrf.mxu0 }
 0x16d   : > { %v754_v11 = vadd.f32 %v1934_v9, %v753_v10  ;;  %v1172_v46 = vsel %vm1170_vm3, %v924_v44, 0 }
 0x16e   : > { %v2025_v12 = vpop.f32.mrf.mxu1  ;;  %v2042_v47 = vpop.f32.mrf.mxu0 }
 0x16f   : > { %v885_v13 = vmul.f32 0.35355338, %v754_v11 }
 0x170   : > { %v756_v14 = vpop.f32.mrf.mxu1 }
 0x171   : > { %887 = vrot.lane.b32.xlu1 %v885_v13, %s2554_s8  ;;  %v896_v24 = vpack.c.bf16 %v885_v13, %v885_v13 }
 0x172   : > { %v2026_v15 = vpop.f32.mrf.mxu1 }
 0x174   : > { %v816_v17 = vpop.f32.mrf.mxu1 }
 0x175   : > { %v817_v18 = vadd.f32 %v1938_v16, %v816_v17 }
 0x176   : > { %v2033_v19 = vpop.f32.mrf.mxu1 }
 0x177   : > { %907 = vrot.lane.b32.xlu1 %v817_v18, %s2555_s29  ;;  %901 = vrot.lane.b32.xlu0 %v817_v18, %s2554_s8  ;;  %v910_v20 = vpack.c.bf16 %v817_v18, %v817_v18 }
 0x178   : > { %v819_v21 = vpop.f32.mrf.mxu1 }
 0x179   : > { %v939_v22 = vsel %vm934_vm2, %v910_v20, 0 }
 0x17a   : > { %v2034_v23 = vpop.f32.mrf.mxu1  ;;  %2044 = vmatpush3.bf16.xpose.msra.mxu1 %v939_v22 }
 0x17b   : > { %893 = vrot.lane.b32.xlu1 %v885_v13, %s2555_s29  ;;  %904 = vrot.lane.b32.xlu0 %v817_v18, %s2556_s20 }
 0x17c   : > { %2055 = vmatprep.subr.bf16.mxu1 %v2552_v0 }
 0x17f   : > { %890 = vrot.lane.b32.xlu0 %v885_v13, %s2556_s20 }
 0x181   : > { %2046 = vmatmul.mubr.msk.bf16.vlgmr.msra.gmra.mxu1 %vm934_vm2, %v896_v24 }
 0x182   : > { %2057 = vmatprep.mubr.msk.bf16.mxu1 %vm2553_vm0, %v2552_v0 }
 0x1e3   : > { %v888_v25 = vpop.permute.xlu1 %887 }
 0x1e4   : > { %v897_v34 = vpack.c.bf16 %v888_v25, %v888_v25 }
 0x1e9   : > { %v902_v26 = vpop.permute.xlu0 %901  ;;  %v908_v29 = vpop.permute.xlu1 %907 }
 0x1ea   : > { %v911_v27 = vpack.c.bf16 %v902_v26, %v902_v26  ;;  %v913_v32 = vpack.c.bf16 %v908_v29, %v908_v29 }
 0x1ec   : > { %v985_v28 = vsel %vm934_vm2, %v911_v27, 0  ;;  %v1077_v36 = vsel %vm934_vm2, %v913_v32, 0 }
 0x1ed   : > { %2050 = vmatpush3.bf16.xpose.msra.mxu0 %v985_v28  ;;  %v905_v30 = vpop.permute.xlu0 %904  ;;  %v894_v38 = vpop.permute.xlu1 %893 }
 0x1ee   : > { %v912_v31 = vpack.c.bf16 %v905_v30, %v905_v30  ;;  %2061 = vmatprep.subr.bf16.mxu0 %v2552_v0  ;;  %v899_v39 = vpack.c.bf16 %v894_v38, %v894_v38 }
 0x1f0   : > { %v1031_v33 = vsel %vm934_vm2, %v912_v31, 0 }
 0x1f1   : > { %2056 = vmatpush3.bf16.xpose.msra.mxu1 %v1031_v33  ;;  %v891_v35 = vpop.permute.xlu0 %890 }
 0x1f2   : > { %2067 = vmatprep.subr.bf16.mxu1 %v2552_v0  ;;  %v898_v37 = vpack.c.bf16 %v891_v35, %v891_v35 }
 0x1f4   : > { %2052 = vmatmul.mubr.msk.bf16.vlgmr.msra.gmra.mxu0 %vm934_vm2, %v897_v34 }
 0x1f5   : > { %2062 = vmatpush3.bf16.xpose.msra.mxu0 %v1077_v36  ;;  %2063 = vmatprep.mubr.msk.bf16.mxu0 %vm2553_vm0, %v2552_v0 }
 0x1f6   : > { %2073 = vmatprep.subr.bf16.mxu0 %v2552_v0 }
 0x1f8   : > { %2058 = vmatmul.mubr.msk.bf16.vlgmr.msra.gmra.mxu1 %vm934_vm2, %v898_v37 }
 0x1f9   : > { %2069 = vmatprep.mubr.msk.bf16.mxu1 %vm2553_vm0, %v2552_v0  ;;  %2068 = vmatpush3.bf16.msra.mxu1 %v1172_v46 }
 0x1fa   : > { %2079 = vmatprep.subr.bf16.mxu1 %v2552_v0 }
 0x1fc   : > { %2064 = vmatmul.mubr.msk.bf16.vlgmr.msra.gmra.mxu0 %vm934_vm2, %v899_v39 }
 0x1fd   : > { %2075 = vmatprep.mubr.msk.bf16.mxu0 %vm2553_vm0, %v2552_v0 }
 0x241   : > { %v975_v49 = vpop.f32.mrf.mxu1 }
 0x242   : > { %v976_v50 = vadd.f32 %v1946_v48, %v975_v49 }
 0x243   : > { %v2047_v51 = vpop.f32.mrf.mxu1 }
 0x244   : > { %v1119_v52 = vsel %vm934_vm2, %v976_v50, -inf }
 0x245   : > { %1120 = vmax.xlane.f32.xlu0 %v1119_v52  ;;  %v978_v53 = vpop.f32.mrf.mxu1 }
 0x247   : > { %v2048_v54 = vpop.f32.mrf.mxu1 }
 0x2b4   : > { %v1021_v55 = vpop.f32.mrf.mxu0 }
 0x2b5   : > { %v1022_v56 = vadd.f32 %v1946_v48, %v1021_v55 }
 0x2b6   : > { %v2053_v57 = vpop.f32.mrf.mxu0 }
 0x2b7   : > { %v1122_v58 = vsel %vm934_vm2, %v1022_v56, -inf }
 0x2b8   : > { %1123 = vmax.xlane.f32.xlu1 %v1122_v58  ;;  %v1024_v59 = vpop.f32.mrf.mxu0  ;;  %v1067_v60 = vpop.f32.mrf.mxu1 }
 0x2b9   : > { %v1068_v61 = vadd.f32 %v1946_v48, %v1067_v60  ;;  %v1358_v60 = vld [vmem:[#allocation11 + $0x8] sm:$0xf] }
 0x2ba   : > { %v2054_v62 = vpop.f32.mrf.mxu0  ;;  %v2059_v63 = vpop.f32.mrf.mxu1 }
 0x2bb   : > { %v1125_v1 = vsel %vm934_vm2, %v1068_v61, -inf  ;;  %v1456_v63 = vsel %vm1170_vm3, %v1358_v60, 0 }
 0x2bc   : > { %v1113_v2 = vpop.f32.mrf.mxu0  ;;  %1126 = vmax.xlane.f32.xlu0 %v1125_v1  ;;  %v1070_v4 = vpop.f32.mrf.mxu1 }
 0x2bd   : > { %v1114_v5 = vadd.f32 %v1946_v48, %v1113_v2 }
 0x2be   : > { %v2060_v6 = vpop.f32.mrf.mxu1  ;;  %v2065_v7 = vpop.f32.mrf.mxu0 }
 0x2bf   : > { %v1128_v8 = vsel %vm934_vm2, %v1114_v5, -inf }
 0x2c0   : > { %v1116_v9 = vpop.f32.mrf.mxu0  ;;  %1129 = vmax.xlane.f32.xlu0 %v1128_v8 }
 0x2c2   : > { %v2066_v10 = vpop.f32.mrf.mxu0 }
 0x2c9   : > { %915 = vrot.lane.b32.xlu1 %v2907_v42, %s2554_s8  ;;  %s3119_s8 = sld [smem:[#allocation32_spill]] }
 0x2ce   : > { %v1121_v11 = vpop.xlane.xlu0 %1120 }
 0x2cf   : > { %v1131_v12 = vsub.f32 %v976_v50, %v1121_v11  ;;  %v1356_v50 = vld [vmem:[#allocation11] sm:$0xf] }
 0x2d0   : > { %v1364_v54 = vsel %vm1170_vm3, %v1356_v50, 0  ;;  %v2255_v50 = vld [vmem:[%s3064_s14 + $0x8] sm:$0xff]  }
 0x2d1   : > { %v1135_v13 = vmul.f32 1.442695, %v1131_v12 }
 0x2d3   : > { %2261 = vpow2.f32 %v1135_v13 }
 0x2e0   : > { %v2262_v14 = vpop.eup %2261 }
 0x2e1   : > { %v1143_v15 = vsel %vm934_vm2, %v2262_v14, 0.0 }
 0x2ed   : > { %1144 = vadd.xlane.f32.xlu1 %v1143_v15 }
 0x341   : > { %v1124_v16 = vpop.xlane.xlu1 %1123 }
 0x342   : > { %v1132_v17 = vsub.f32 %v1022_v56, %v1124_v16  ;;  %v1357_v56 = vld [vmem:[#allocation11 + $0x4] sm:$0xf] }
 0x343   : > { %v1410_v59 = vsel %vm1170_vm3, %v1357_v56, 0 }
 0x344   : > { %v1137_v18 = vmul.f32 1.442695, %v1132_v17 }
 0x345   : > { %v916_v19 = vpop.permute.xlu1 %915  ;;  %v1127_v20 = vpop.xlane.xlu0 %1126 }
 0x346   : > { %2263 = vpow2.f32 %v1137_v18  ;;  %v925_v21 = vpack.c.bf16 %v916_v19, %v916_v19  ;;  %v1133_v22 = vsub.f32 %v1068_v61, %v1127_v20 }
 0x348   : > { %v1218_v23 = vsel %vm1170_vm3, %v925_v21, 0  ;;  %v1139_v24 = vmul.f32 1.442695, %v1133_v22 }
 0x349   : > { %2074 = vmatpush3.bf16.msra.mxu0 %v1218_v23  ;;  %v1130_v25 = vpop.xlane.xlu0 %1129 }
 0x34a   : > { %2265 = vpow2.f32 %v1139_v24  ;;  %v1134_v26 = vsub.f32 %v1114_v5, %v1130_v25  ;;  %2085 = vmatprep.subr.bf16.mxu0 %v2552_v0  ;;  %v1359_v5 = vld [vmem:[#allocation11 + $0xc] sm:$0xf] }
 0x34b   : > { %v1502_v8 = vsel %vm1170_vm3, %v1359_v5, 0 }
 0x34c   : > { %v1141_v27 = vmul.f32 1.442695, %v1134_v26 }
 0x34e   : > { %2267 = vpow2.f32 %v1141_v27 }
 0x353   : > { %v2264_v28 = vpop.eup %2263 }
 0x354   : > { %v1146_v29 = vsel %vm934_vm2, %v2264_v28, 0.0 }
 0x355   : > { %1147 = vadd.xlane.f32.xlu0 %v1146_v29 }
 0x357   : > { %v2266_v30 = vpop.eup %2265 }
 0x358   : > { %v1149_v31 = vsel %vm934_vm2, %v2266_v30, 0.0 }
 0x359   : > { %1150 = vadd.xlane.f32.xlu1 %v1149_v31 }
 0x35b   : > { %v2268_v32 = vpop.eup %2267 }
 0x35c   : > { %v1152_v33 = vsel %vm934_vm2, %v2268_v32, 0.0 }
 0x35d   : > { %1153 = vadd.xlane.f32.xlu0 %v1152_v33 }
 0x36a   : > { %921 = vrot.lane.b32.xlu1 %v2907_v42, %s2555_s29  ;;  %s1975_s29 = sshll.u32 %s2674_s1, 7  ;;  %s2471_s1 = scalar_lea.vmem %s2470_s0, 256 }
 0x36b   : > { %s1777_s6 = scalar_lea.hbm %s3120_s24, %s1975_s29 }
 0x373   : > { %918 = vrot.lane.b32.xlu0 %v2907_v42, %s2556_s20  ;;  %s679_s20 = scalar_lea.vmem [#allocation14], %s1932_s26 }
 0x374   : > { %s1779_s3 = sshll.u32 %s679_s20, 4  ;;  %s1780_s3 = int_to_ptr.vmem [resolvable:$true] %s1779_s3 }
 0x375   : > { %s2465_s13 = scalar_lea.vmem %s1780_s3, 128  ;;  %p2472_p10 = scmp.lt.s32.totalorder %s1780_s3, %s2470_s0 }
 0x376   : > { %v1145_v34 = vpop.xlane.xlu1 %1144  ;;  %p2466_p2 = scmp.ne.s32.totalorder %s1780_s3, %s2465_s13  ;;  %p2473_p12 = scmp.lt.s32.totalorder %s2471_s1, %s2465_s13 }
 0x377   : > { %2269 = vrcp.f32 %v1145_v34 }
 0x378   : > { %p2467_p8 = pnand %p2466_p2, %p3121_p5  ;;  %p2474_p1 = por %p2473_p12, %p2472_p10 }
 0x37a   : > { %p2468_p7 = pneg %p2467_p8 }
 0x37c   : > { %p2475_p3 = pnand %p2474_p1, %p2468_p7 }
 0x384   : > { %v2270_v35 = vpop.eup %2269 }
 0x385   : > { %v1159_v36 = vmul.f32 %v2270_v35, %v2262_v14 }
 0x387   : > { %v1163_v37 = vpack.c.bf16 %v1159_v36, %v1159_v36  ;;  %v1959_v36 = vld [vmem:[#allocation13] ss:$0 sm:$0xff] }
 0x389   : > { %2070 = vmatmul.mubr.msk.bf16.vlgmr.msra.gmra.mxu1 %vm934_vm2, %v1163_v37 }
 0x38a   : > { %2081 = vmatprep.mubr.msk.bf16.mxu1 %vm2553_vm0, %v2552_v0 }
 0x3de   : > { %v1148_v38 = vpop.xlane.xlu0 %1147 }
 0x3df   : > { %2271 = vrcp.f32 %v1148_v38 }
 0x3e2   : > { %v1151_v39 = vpop.xlane.xlu1 %1150 }
 0x3e3   : > { %2273 = vrcp.f32 %v1151_v39 }
 0x3e6   : > { %v1154_v40 = vpop.xlane.xlu0 %1153  ;;  %v922_v41 = vpop.permute.xlu1 %921 }
 0x3e7   : > { %2275 = vrcp.f32 %v1154_v40  ;;  %v927_v45 = vpack.c.bf16 %v922_v41, %v922_v41 }
 0x3e9   : > { %v1310_v51 = vsel %vm1170_vm3, %v927_v45, 0 }
 0x3ea   : > { %v919_v43 = vpop.permute.xlu0 %918 }
 0x3eb   : > { %v926_v44 = vpack.c.bf16 %v919_v43, %v919_v43 }
 0x3ec   : > { %v2272_v42 = vpop.eup %2271 }
 0x3ed   : > { %v1264_v46 = vsel %vm1170_vm3, %v926_v44, 0  ;;  %v1160_v47 = vmul.f32 %v2272_v42, %v2264_v28 }
 0x3ee   : > { %2080 = vmatpush3.bf16.msra.mxu1 %v1264_v46 }
 0x3ef   : > { %v1164_v48 = vpack.c.bf16 %v1160_v47, %v1160_v47  ;;  %2091 = vmatprep.subr.bf16.mxu1 %v2552_v0 }
 0x3f0   : > { %v2274_v49 = vpop.eup %2273 }
 0x3f1   : > { %2076 = vmatmul.mubr.msk.bf16.vlgmr.msra.gmra.mxu0 %vm934_vm2, %v1164_v48  ;;  %v1161_v52 = vmul.f32 %v2274_v49, %v2266_v30 }
 0x3f2   : > { %2086 = vmatpush3.bf16.msra.mxu0 %v1310_v51  ;;  %2087 = vmatprep.mubr.msk.bf16.mxu0 %vm2553_vm0, %v2552_v0  ;;  %v2257_v51 = vld [vmem:[%s3066_s16 + $0x18] sm:$0xff]  }
 0x3f3   : > { %v1165_v53 = vpack.c.bf16 %v1161_v52, %v1161_v52  ;;  %2097 = vmatprep.subr.bf16.mxu0 %v2552_v0  ;;  %v2258_v52 = vld [vmem:[%s3066_s16 + $0x10] sm:$0xff]  }
 0x3f4   : > { %v2276_v55 = vpop.eup %2275 }
 0x3f5   : > { %2082 = vmatmul.mubr.msk.bf16.vlgmr.msra.gmra.mxu1 %vm934_vm2, %v1165_v53  ;;  %v1162_v57 = vmul.f32 %v2276_v55, %v2268_v32 }
 0x3f6   : > { %2092 = vmatpush3.bf16.msra.mxu1 %v1364_v54  ;;  %2093 = vmatprep.mubr.msk.bf16.mxu1 %vm2553_vm0, %v2552_v0 }
 0x3f7   : > { %v1166_v58 = vpack.c.bf16 %v1162_v57, %v1162_v57  ;;  %2103 = vmatprep.subr.bf16.mxu1 %v2552_v0  ;;  %v1960_v57 = vld [vmem:[%s3060_s10] ss:$0 sm:$0xff] }
 0x3f9   : > { %2088 = vmatmul.mubr.msk.bf16.vlgmr.msra.gmra.mxu0 %vm934_vm2, %v1166_v58 }
 0x3fa   : > { %2098 = vmatpush3.bf16.msra.mxu0 %v1410_v59  ;;  %2099 = vmatprep.mubr.msk.bf16.mxu0 %vm2553_vm0, %v2552_v0  ;;  %v1961_v59 = vld [vmem:[%s3061_s11] ss:$0 sm:$0xff] }
 0x3fb   : > { %2109 = vmatprep.subr.bf16.mxu0 %v2552_v0 }
 0x449   : > { %v1208_v61 = vpop.f32.mrf.mxu1 }
 0x44a   : > { %v1352_v62 = vpack.c.bf16 %v1208_v61, %v1208_v61 }
 0x44b   : > { %v2071_v1 = vpop.f32.mrf.mxu1 }
 0x44c   : > { %2094 = vmatmul.mubr.msk.bf16.vlgmr.msra.gmra.mxu1 %vm934_vm2, %v1352_v62  ;;  %v2260_v1 = vld [vmem:[%s3066_s16] sm:$0xff]  }
 0x44d   : > { %v1211_v2 = vpop.f32.mrf.mxu1  ;;  %2104 = vmatpush3.bf16.msra.mxu1 %v1456_v63  ;;  %2105 = vmatprep.mubr.msk.bf16.mxu1 %vm2553_vm0, %v2552_v0  ;;  %v2259_v63 = vld [vmem:[%s3066_s16 + $0x8] sm:$0xff]  }
 0x44e   : > { %2115 = vmatprep.subr.bf16.mxu1 %v2552_v0  ;;  %v1962_v2 = vld [vmem:[%s3065_s15] ss:$0 sm:$0xff] }
 0x44f   : > { %v2072_v4 = vpop.f32.mrf.mxu1 }
 0x4b1   : > { %v1254_v6 = vpop.f32.mrf.mxu0 }
 0x4b2   : > { %v1353_v7 = vpack.c.bf16 %v1254_v6, %v1254_v6 }
 0x4b3   : > { %v2077_v9 = vpop.f32.mrf.mxu0 }
 0x4b4   : > { %2100 = vmatmul.mubr.msk.bf16.vlgmr.msra.gmra.mxu0 %vm934_vm2, %v1353_v7 }
 0x4b5   : > { %v1257_v10 = vpop.f32.mrf.mxu0  ;;  %v1300_v11 = vpop.f32.mrf.mxu1  ;;  %2110 = vmatpush3.bf16.msra.mxu0 %v1502_v8  ;;  %2111 = vmatprep.mubr.msk.bf16.mxu0 %vm2553_vm0, %v2552_v0 }
 0x4b6   : > { %v1354_v12 = vpack.c.bf16 %v1300_v11, %v1300_v11  ;;  %2123 = vmatprep.subr.bf16.mxu0 %v2552_v0 }
 0x4b7   : > { %v2078_v13 = vpop.f32.mrf.mxu0  ;;  %v2083_v14 = vpop.f32.mrf.mxu1 }
 0x4b8   : > { %2106 = vmatmul.mubr.msk.bf16.vlgmr.msra.gmra.mxu1 %vm934_vm2, %v1354_v12 }
 0x4b9   : > { %v1303_v15 = vpop.f32.mrf.mxu1  ;;  %v1346_v16 = vpop.f32.mrf.mxu0  ;;  %2119 = vmatprep.mubr.msk.bf16.mxu1 %vm2553_vm0, %v2552_v0  ;;  %2116 = vmatpush3.bf16.msra.mxu1 %v2255_v50 }
 0x4ba   : > { %v1355_v17 = vpack.c.bf16 %v1346_v16, %v1346_v16  ;;  %2117 = vmatprep.subr.bf16.mxu1 %v2552_v0 }
 0x4bb   : > { %v2084_v18 = vpop.f32.mrf.mxu1  ;;  %v2089_v19 = vpop.f32.mrf.mxu0 }
 0x4bc   : > { %2112 = vmatmul.mubr.msk.bf16.vlgmr.msra.gmra.mxu0 %vm934_vm2, %v1355_v17 }
 0x4bd   : > { %v1349_v20 = vpop.f32.mrf.mxu0  ;;  %2131 = vmatprep.mubr.msk.bf16.mxu0 %vm2553_vm0, %v2552_v0  ;;  %2124 = vmatpush3.bf16.msra.mxu0 %v2257_v51 }
 0x4be   : > { %2125 = vmatprep.subr.bf16.mxu0 %v2552_v0 }
 0x4bf   : > { %v2090_v21 = vpop.f32.mrf.mxu0 }
 0x4c1   : > { %2126 = vmatpush3.bf16.msra.mxu0 %v2258_v52 }
 0x4c2   : > { %2127 = vmatprep.subr.bf16.mxu0 %v2552_v0 }
 0x4c5   : > { %2128 = vmatpush3.bf16.msra.mxu0 %v2259_v63 }
 0x4c6   : > { %2129 = vmatprep.subr.bf16.mxu0 %v2552_v0  ;;  %v1966_v0 = vld [vmem:[%s3067_s17] ss:$0 sm:$0xff] }
 0x4c9   : > { %2130 = vmatpush3.bf16.msra.mxu0 %v2260_v1 }
 0x50c   : > { %v1400_v22 = vpop.f32.mrf.mxu1 }
 0x50e   : > { %v2095_v23 = vpop.f32.mrf.mxu1 }
 0x510   : > { %v1403_v24 = vpop.f32.mrf.mxu1 }
 0x512   : > { %v2096_v25 = vpop.f32.mrf.mxu1 }
 0x574   : > { %v1446_v26 = vpop.f32.mrf.mxu0 }
 0x575   : > { %v1544_v30 = vadd.f32 %v1446_v26, %v1400_v22 }
 0x576   : > { %v2101_v27 = vpop.f32.mrf.mxu0 }
 0x577   : > { %v1972_v27 = vld [vmem:[%s3062_s12] ss:$0 sm:$0xff] }
 0x578   : > { %v1449_v28 = vpop.f32.mrf.mxu0  ;;  %v1492_v29 = vpop.f32.mrf.mxu1 }
 0x579   : > { %v1545_v33 = vadd.f32 %v1544_v30, %v1492_v29  ;;  %v1973_v29 = vld [vmem:[%s3119_s8] ss:$0 sm:$0xff] }
 0x57a   : > { %v2102_v31 = vpop.f32.mrf.mxu0  ;;  %v2107_v32 = vpop.f32.mrf.mxu1 }
 0x57c   : > { %v1495_v34 = vpop.f32.mrf.mxu1  ;;  %v1538_v35 = vpop.f32.mrf.mxu0 }
 0x57d   : > { %v1546_v37 = vadd.f32 %v1545_v33, %v1538_v35 }
 0x57e   : > { %v2108_v38 = vpop.f32.mrf.mxu1  ;;  %v2113_v39 = vpop.f32.mrf.mxu0 }
 0x57f   : > { %v1554_v40 = vadd.f32 %v1959_v36, %v1546_v37 }
 0x580   : > { %v1541_v41 = vpop.f32.mrf.mxu0 }
 0x581   : > { %v1555_v43 = vadd.f32 %v1554_v40, %v2856_v3  ;;  %v2256_v3 = vld [vmem:[%s3064_s14] sm:$0xff]  }
 0x582   : > { %v2114_v44 = vpop.f32.mrf.mxu0  ;;  %2118 = vmatpush3.bf16.msra.mxu1 %v2256_v3 }
 0x583   : > { %v1556_v42 = vsel %vm715_vm1, %v1555_v43, 0.0 }
 0x584   : > { %1557 = vadd.xlane.f32.xlu1 %v1556_v42 }
 0x60d   : > { %v1558_v45 = vpop.xlane.xlu1 %1557 }
 0x60e   : > { %v1560_v46 = vmul.f32 0.03125, %v1558_v45 }
 0x610   : > { %v1561_v47 = vsub.f32 %v1555_v43, %v1560_v46 }
 0x612   : > { %v1562_v48 = vmul.f32 %v1561_v47, %v1561_v47 }
 0x614   : > { %v1563_v49 = vsel %vm715_vm1, %v1562_v48, 0.0 }
 0x615   : > { %1564 = vadd.xlane.f32.xlu0 %v1563_v49 }
 0x69e   : > { %v1565_v53 = vpop.xlane.xlu0 %1564 }
 0x69f   : > { %v1566_v54 = vmul.f32 0.03125, %v1565_v53 }
 0x6a1   : > { %v1567_v55 = vadd.f32 1e-05, %v1566_v54 }
 0x6a3   : > { %2277 = vrsqrt.f32 %v1567_v55 }
 0x6b0   : > { %v2278_v56 = vpop.eup %2277 }
 0x6b1   : > { %v1569_v58 = vmul.f32 %v2278_v56, %v1561_v47 }
 0x6b3   : > { %v1576_v60 = vmul.f32 %v1960_v57, %v1569_v58 }
 0x6b5   : > { %v1583_v61 = vadd.f32 %v1961_v59, %v1576_v60 }
 0x6b7   : > { %v1584_v62 = vpack.c.bf16 %v1583_v61, %v1583_v61 }
 0x6b9   : > { %2120 = vmatmul.mubr.msk.bf16.vlgmr.msra.gmra.mxu1 %vm715_vm1, %v1584_v62 }
 0x779   : > { %v1645_v4 = vpop.f32.mrf.mxu1 }
 0x77a   : > { %v1646_v5 = vadd.f32 %v1962_v2, %v1645_v4 }
 0x77b   : > { %v2121_v6 = vpop.f32.mrf.mxu1 }
 0x77c   : > { %v1651_v7 = vmax.f32 %v1646_v5, 0.0 }
 0x77d   : > { %v1648_v8 = vpop.f32.mrf.mxu1 }
 0x77e   : > { %v1652_v9 = vpack.c.bf16 %v1651_v7, %v1651_v7 }
 0x77f   : > { %v2122_v10 = vpop.f32.mrf.mxu1 }
 0x780   : > { %2132 = vmatmul.mubr.msk.bf16.vlgmr.msra.gmra.mxu0 %vm1692_vm4, %v1652_v9 }
 0x840   : > { %v1730_v11 = vpop.f32.mrf.mxu0 }
 0x841   : > { %v1731_v12 = vadd.f32 %v1966_v0, %v1730_v11 }
 0x842   : > { %v2133_v13 = vpop.f32.mrf.mxu0 }
 0x843   : > { %v1736_v14 = vadd.f32 %v1731_v12, %v1583_v61 }
 0x844   : > { %v1733_v15 = vpop.f32.mrf.mxu0 }
 0x845   : > { %v1737_v16 = vsel %vm715_vm1, %v1736_v14, 0.0 }
 0x846   : > { %1738 = vadd.xlane.f32.xlu0 %v1737_v16  ;;  %v2134_v17 = vpop.f32.mrf.mxu0 }
 0x8cf   : > { %v1739_v18 = vpop.xlane.xlu0 %1738 }
 0x8d0   : > { %v1740_v19 = vmul.f32 0.03125, %v1739_v18 }
 0x8d2   : > { %v1741_v20 = vsub.f32 %v1736_v14, %v1740_v19 }
 0x8d4   : > { %v1742_v21 = vmul.f32 %v1741_v20, %v1741_v20 }
 0x8d6   : > { %v1743_v22 = vsel %vm715_vm1, %v1742_v21, 0.0 }
 0x8d7   : > { %1744 = vadd.xlane.f32.xlu1 %v1743_v22 }
 0x960   : > { %v1745_v23 = vpop.xlane.xlu1 %1744 }
 0x961   : > { %v1746_v24 = vmul.f32 0.03125, %v1745_v23 }
 0x963   : > { %v1747_v25 = vadd.f32 1e-05, %v1746_v24 }
 0x965   : > { %2279 = vrsqrt.f32 %v1747_v25 }
 0x972   : > { %v2280_v26 = vpop.eup %2279 }
 0x973   : > { %v1749_v28 = vmul.f32 %v2280_v26, %v1741_v20 }
 0x975   : > { %v1756_v30 = vmul.f32 %v1972_v27, %v1749_v28 }
 0x977   : > { %v1763_v31 = vadd.f32 %v1973_v29, %v1756_v30 }
 0x979   : > { %1764 = vst.msk [vmem:[%s679_s20] sm:$0xff] %vm715_vm1, %v1763_v31 }
 0x97a   : > { %2478 = shalt.err (!%p2475_p3)
}
 0x97b   : > { %s2479_s26 = scalar_lea.hbm %s1777_s6, 128  ;;  %s2483_s8 = scalar_lea.hbm %s3120_s24, 256 }
 0x97c   : > { %p2480_p6 = scmp.ne.s32.totalorder %s1777_s6, %s2479_s26  ;;  %p2484_p11 = scmp.lt.s32.totalorder %s1777_s6, %s3120_s24 }
 0x97d   : > { %p2485_p13 = scmp.lt.s32.totalorder %s2483_s8, %s2479_s26 }
 0x97e   : > { %p2481_p4 = pnand %p2480_p6, %p3121_p5 }
 0x97f   : > { %p2486_p0 = por %p2485_p13, %p2484_p11 }
 0x980   : > { %p2482_p9 = pneg %p2481_p4 }
 0x982   : > { %p2487_p2 = pnand %p2486_p0, %p2482_p9 }
 0x984   : > { %2490 = shalt.err (!%p2487_p2)
}
 0x985   : > { %2161 = dma.vmem_to_hbm [thread:$0]  (%p3121_p5), %s1780_s3, 128, %s1777_s6, %s1766_s25  }
 0x986 PF: > { %s1791_s2 = sand.u32 1, %s2529_s27   ;;  %p3122_p8 = scmp.ne.s32.totalorder %s3106_s21, 0 }
 0x987   : > { %p3123_p7 = scmp.ge.s32.totalorder %s2541_s30, 2  ;;  %s1792_s18 = scalar_lea.sflag [#allocation4], %s1791_s2 }
 0x989   : > { %p2187_p10 = pnand %p3123_p7, %p3122_p8 }
 0x98b   : > { %p2188_p12 = pneg %p2187_p10 }
 0x98d   : > { %2524 = dma.done.wait (%p2188_p12), %s1792_s18, 128  }
 0x98e   : > { %2526 = vsyncadd (%p2188_p12), %s1792_s18, 4294967168  ;;  %s3124_s30 = sld [smem:[#allocation21_spill]]  ;;  %s3127_s27 = smov %s2533_s28 }
 0x98f   : > { %s3125_s13 = sld [smem:[#allocation20_spill]] }
 0x990   : > { %s3126_s29 = sld [smem:[#allocation22_spill]] }
 0x994   : > { %p34_p1 = scmp.ge.s32.totalorder %s3124_s30, 4  }
 0x995   : > { %s3128_s28 = smov %s3125_s13 }
 0x996   :  { %36 = sbr.rel (!%p34_p1) target bundleno = 20 (0x14), region = 164 }
 0x99b   :  { %1797 = vsyncpa [#allocation3], 1 }
 0x99c   :  { %1799 = vsyncpa [#allocation3 + $0x1], 1 }
 0x99d   :  { %1800 = vsyncpa [#allocation6], 1 }
 0x99e   :  { %1801 = vsyncpa [#allocation9], 1 }
 0x99f   :  { %1802 = vsyncpa [#allocation12], 1 }
 0x9a0   :  { %1803 = vsyncpa [#allocation4], 1 }
 0x9a1   :  { %1805 = vsyncpa [#allocation4 + $0x1], 1 }

</bundles_post_ra>
